<compile_context>
chip_gen: v7x
topology: tpu7x:2x2x1
jax: 0.10.0
libtpu: 0.0.40
codegen_flags: <defaults>
</compile_context>

<pallas_src>
import functools
import math

import jax
import jax.numpy as jnp
from jax import lax
from jax.experimental import pallas as pl
from jax.experimental.pallas import tpu as pltpu

VMEM_SPEC = pl.BlockSpec(memory_space=pltpu.MemorySpace.VMEM)


# ---------------- fused LayerNorm + bidirectional LSTM layer kernel ----------
def bilstm_layer_kernel(x_ref, ln_g_ref, ln_b_ref, wih_ref, whh_ref, b_ref,
                        len_ref, y_ref, hfin_ref, xg_scr, h_scr, c_scr,
                        *, T, H, apply_ln, ln_eps):
    Bp = x_ref.shape[1]
    I = x_ref.shape[2]
    H2 = 2 * H
    H8 = 8 * H

    x = x_ref[...]                                            # (T, Bp, I)
    if apply_ln:                                              # LN fused into layer 0
        mean = jnp.mean(x, axis=-1, keepdims=True)
        var = jnp.mean((x - mean) ** 2, axis=-1, keepdims=True)
        x = (x - mean) * lax.rsqrt(var + ln_eps) * ln_g_ref[...] + ln_b_ref[...]

    # Hoisted input projection: all timesteps, both directions, bias folded in.
    # Column layout of wih/whh/b is gate-major, direction-minor:
    #   [i_f i_b | f_f f_b | g_f g_b | o_f o_b], each block of width H.
    xg = (jnp.dot(x.reshape(T * Bp, I), wih_ref[...],
                  preferred_element_type=jnp.float32) + b_ref[...])
    xg_scr[...] = xg.reshape(T, Bp, H8)

    h_scr[...] = jnp.zeros_like(h_scr)                        # (Bp, 2H) = [h_f | h_b]
    c_scr[...] = jnp.zeros_like(c_scr)

    lens = len_ref[...]                                       # (Bp, 1) int32
    # Constant lane masks, hoisted out of the recurrence.
    lane8 = lax.broadcasted_iota(jnp.int32, (Bp, H8), 1)
    fwd_lane8 = (lane8 % H2) < H                              # fwd lanes of each gate block
    lane2 = lax.broadcasted_iota(jnp.int32, (Bp, H2), 1)
    fwd_lane2 = lane2 < H                                     # fwd half of the state

    def step(s, carry):
        tf = s                                                # forward time index
        tb = T - 1 - s                                        # backward time index
        # Assemble the precomputed input gates: fwd lanes from time tf,
        # bwd lanes from time tb (single VPU select, no per-step matmul/bias).
        g_in = jnp.where(fwd_lane8, xg_scr[tf], xg_scr[tb])   # (Bp, 8H)
        gates = g_in + jnp.dot(h_scr[...], whh_ref[...],
                               preferred_element_type=jnp.float32)
        i_g = jax.nn.sigmoid(gates[:, 0:H2])                  # each (Bp, 2H) = [f | b]
        f_g = jax.nn.sigmoid(gates[:, H2:2 * H2])
        g_g = jnp.tanh(gates[:, 2 * H2:3 * H2])
        o_g = jax.nn.sigmoid(gates[:, 3 * H2:4 * H2])

        c_new = f_g * c_scr[...] + i_g * g_g
        h_new = o_g * jnp.tanh(c_new)

        valid_f = tf < lens                                   # (Bp, 1) bool
        valid_b = tb < lens
        t_sel = jnp.where(fwd_lane2, tf, tb)                  # (Bp, 2H) int32
        mask = t_sel < lens                                   # per-half validity
        c_scr[...] = jnp.where(mask, c_new, c_scr[...])       # packed-seq: freeze state
        h_scr[...] = jnp.where(mask, h_new, h_scr[...])

        # Write fwd/bwd halves of the single (T, Bp, 2H) output; padded -> 0.
        y_ref[tf, :, 0:H] = jnp.where(valid_f, h_new[:, 0:H], 0.0)
        y_ref[tb, :, H:H2] = jnp.where(valid_b, h_new[:, H:H2], 0.0)
        return carry

    lax.fori_loop(0, T, step, 0, unroll=True)
    hfin_ref[...] = h_scr[...]                                # [h_f_final | h_b_final]


def bilstm_layer(x_tbi, ln_g, ln_b, wih, whh, b, len2d, *, H, apply_ln,
                 ln_eps=1e-5):
    T, Bp, _ = x_tbi.shape
    return pl.pallas_call(
        functools.partial(bilstm_layer_kernel, T=T, H=H,
                          apply_ln=apply_ln, ln_eps=ln_eps),
        out_shape=(jax.ShapeDtypeStruct((T, Bp, 2 * H), jnp.float32),
                   jax.ShapeDtypeStruct((Bp, 2 * H), jnp.float32)),
        in_specs=[VMEM_SPEC] * 7,
        out_specs=(VMEM_SPEC, VMEM_SPEC),
        scratch_shapes=[pltpu.VMEM((T, Bp, 8 * H), jnp.float32),  # hoisted x-projection
                        pltpu.VMEM((Bp, 2 * H), jnp.float32),      # h state
                        pltpu.VMEM((Bp, 2 * H), jnp.float32)],     # c state
    )(x_tbi, ln_g, ln_b, wih, whh, b, len2d)


# --------------------- attention + classifier fused kernel ------------------
def attn_cls_kernel(out_ref, hcat_ref, wa_h_ref, wa_o_ref, ba_ref, v_ref,
                    wc_ref, bc_ref, ctx_ref, pred_ref, attw_ref):
    out = out_ref[...]                                        # (Bp, T, 2H)
    Bp, T, K = out.shape
    hcat = hcat_ref[...]                                      # (Bp, 2H)
    # energy = tanh([hidden ; encoder_output] @ Wa + ba), split into two matmuls
    e_h = jnp.dot(hcat, wa_h_ref[...], preferred_element_type=jnp.float32)
    e_o = jnp.dot(out.reshape(Bp * T, K), wa_o_ref[...],
                  preferred_element_type=jnp.float32).reshape(Bp, T, -1)
    energy = jnp.tanh(e_h[:, None, :] + e_o + ba_ref[...])    # (Bp, T, H)
    scores = jnp.sum(energy * v_ref[...], axis=-1)            # (Bp, T)
    # softmax over the sequence axis (torch softmax(dim=0) on (seq, batch))
    m = jnp.max(scores, axis=-1, keepdims=True)
    p = jnp.exp(scores - m)
    w = p / jnp.sum(p, axis=-1, keepdims=True)                # (Bp, T)
    # context via batched MXU matmul (== torch.bmm(attn_weights, output))
    ctx = jnp.einsum('bqt,btk->bqk', w[:, None, :], out,
                     preferred_element_type=jnp.float32)[:, 0, :]   # (Bp, 2H)
    pred = jnp.dot(ctx, wc_ref[...], preferred_element_type=jnp.float32) + bc_ref[...]
    ctx_ref[...] = ctx
    pred_ref[...] = pred
    attw_ref[...] = w


# --------------------------------- forward ----------------------------------
def cpg_forward(params, tokens, lengths, *, E, H, num_layers):
    B, T = tokens.shape
    Bp = max(8, ((B + 7) // 8) * 8)                           # pad batch to 8 sublanes
    tokens_p = jnp.zeros((Bp, T), jnp.int32).at[:B].set(tokens.astype(jnp.int32))
    lengths_p = jnp.zeros((Bp,), jnp.int32).at[:B].set(lengths.astype(jnp.int32))

    # Embedding gather in XLA, directly into time-major (T, Bp, E) layout.
    emb = jnp.take(params['emb'], tokens_p.T, axis=0)         # (T, Bp, E)
    len2d = lengths_p.reshape(Bp, 1)

    x = emb
    hfin = None
    for l in range(num_layers):
        wih, whh, b = params[f'lstm_l{l}']
        x, hfin = bilstm_layer(x, params['ln_g'], params['ln_b'], wih, whh, b,
                               len2d, H=H, apply_ln=(l == 0))
        # TODO(synk): inter-layer LSTM dropout omitted (stochastic; eval-mode semantics).

    output = jnp.transpose(x, (1, 0, 2))                      # (Bp, T, 2H)
    hidden_cat = hfin                                         # (Bp, 2H) = cat(hidden[-2], hidden[-1])

    ctx, pred, attw = pl.pallas_call(
        attn_cls_kernel,
        out_shape=(jax.ShapeDtypeStruct((Bp, 2 * H), jnp.float32),
                   jax.ShapeDtypeStruct((Bp, 1), jnp.float32),
                   jax.ShapeDtypeStruct((Bp, T), jnp.float32)),
        in_specs=[VMEM_SPEC] * 8,
        out_specs=(VMEM_SPEC, VMEM_SPEC, VMEM_SPEC),
    )(output, hidden_cat, params['attn_w_h'], params['attn_w_o'],
      params['attn_b'], params['v'], params['cls_w'], params['cls_b'])

    # TODO(synk): nn.Dropout on the context vector omitted (identity at inference).
    return ctx[:B], pred[:B, 0], attw[:B]   # (attn_applied, prediction, attn_weights)


# ------------------------ parameter construction ----------------------------
def fuse_bilstm_weights(fwd, bwd, H):
    """Fuse per-direction LSTM weights into the kernel's layout.

    Columns are gate-major, direction-minor: [i_f i_b f_f f_b g_f g_b o_f o_b].
    whh is block-structured so h = [h_f | h_b] only feeds its own direction.
    """
    (wih_f, whh_f, b_f), (wih_b, whh_b, b_b) = fwd, bwd
    in_sz = wih_f.shape[0]
    wih = jnp.stack([wih_f.reshape(in_sz, 4, H),
                     wih_b.reshape(in_sz, 4, H)], axis=2).reshape(in_sz, 8 * H)
    wf4 = whh_f.reshape(H, 4, H)
    wb4 = whh_b.reshape(H, 4, H)
    top = jnp.stack([wf4, jnp.zeros_like(wf4)], axis=2).reshape(H, 8 * H)
    bot = jnp.stack([jnp.zeros_like(wb4), wb4], axis=2).reshape(H, 8 * H)
    whh = jnp.concatenate([top, bot], axis=0)                 # (2H, 8H)
    b = jnp.stack([b_f.reshape(4, H), b_b.reshape(4, H)], axis=1).reshape(1, 8 * H)
    return wih, whh, b


def init_params(key, input_dim, E, H, num_layers):
    keys = iter(jax.random.split(key, 40))
    p = {}
    emb = jax.random.normal(next(keys), (input_dim, E), jnp.float32) * 0.1
    p['emb'] = emb.at[0].set(0.0)                             # padding_idx=0
    p['ln_g'] = jnp.ones((1, E), jnp.float32)
    p['ln_b'] = jnp.zeros((1, E), jnp.float32)
    s = 1.0 / math.sqrt(H)
    for l in range(num_layers):
        in_sz = E if l == 0 else 2 * H
        per_dir = []
        for _tag in ('f', 'b'):
            wih = jax.random.uniform(next(keys), (in_sz, 4 * H), jnp.float32, -s, s)
            whh = jax.random.uniform(next(keys), (H, 4 * H), jnp.float32, -s, s)
            bih = jax.random.uniform(next(keys), (4 * H,), jnp.float32, -s, s)
            bhh = jax.random.uniform(next(keys), (4 * H,), jnp.float32, -s, s)
            per_dir.append((wih, whh, bih + bhh))
        p[f'lstm_l{l}'] = fuse_bilstm_weights(per_dir[0], per_dir[1], H)
    sa = 1.0 / math.sqrt(4 * H)
    wa = jax.random.uniform(next(keys), (4 * H, H), jnp.float32, -sa, sa)
    p['attn_w_h'] = wa[:2 * H]                                # acts on repeated hidden_cat
    p['attn_w_o'] = wa[2 * H:]                                # acts on encoder outputs
    p['attn_b'] = jax.random.uniform(next(keys), (1, H), jnp.float32, -sa, sa)
    sv = 1.0 / math.sqrt(H)
    p['v'] = jax.random.uniform(next(keys), (1, H), jnp.float32, -sv, sv)
    sc = 1.0 / math.sqrt(2 * H)
    p['cls_w'] = jax.random.uniform(next(keys), (2 * H, 1), jnp.float32, -sc, sc)
    p['cls_b'] = jax.random.uniform(next(keys), (1, 1), jnp.float32, -sc, sc)
    return p


if __name__ == "__main__":
    INPUT_DIM, E, H, L = 5, 32, 32, 2
    B, T = 2, 8
    key = jax.random.PRNGKey(0)
    pkey, tkey = jax.random.split(key)
    params = init_params(pkey, INPUT_DIM, E, H, L)

    lengths = jnp.array([8, 5], dtype=jnp.int32)
    tokens = jax.random.randint(tkey, (B, T), 1, INPUT_DIM, dtype=jnp.int32)
    tokens = jnp.where(jnp.arange(T)[None, :] < lengths[:, None], tokens, 0)  # pad with idx 0

    attn_applied, prediction, attn_weights = jax.block_until_ready(
        cpg_forward(params, tokens, lengths, E=E, H=H, num_layers=L))

    assert attn_applied.shape == (B, 2 * H)
    assert prediction.shape == (B,)
    assert attn_weights.shape == (B, T)
    assert bool(jnp.all(jnp.isfinite(prediction)))
    print("KERNEL_OK")
</pallas_src>

<mosaic_0001>
module attributes {stable_mosaic.version = 11 : i64} {
  func.func @bilstm_layer_kernel(%arg0: memref<8x8x32xf32, #tpu.memory_space<vmem>>, %arg1: memref<1x32xf32, #tpu.memory_space<vmem>>, %arg2: memref<1x32xf32, #tpu.memory_space<vmem>>, %arg3: memref<32x256xf32, #tpu.memory_space<vmem>>, %arg4: memref<64x256xf32, #tpu.memory_space<vmem>>, %arg5: memref<1x256xf32, #tpu.memory_space<vmem>>, %arg6: memref<8x1xi32, #tpu.memory_space<vmem>>, %arg7: memref<8x8x64xf32, #tpu.memory_space<vmem>>, %arg8: memref<8x64xf32, #tpu.memory_space<vmem>>, %arg9: memref<8x8x256xf32, #tpu.memory_space<vmem>>, %arg10: memref<8x64xf32, #tpu.memory_space<vmem>>, %arg11: memref<8x64xf32, #tpu.memory_space<vmem>>) attributes {dimension_semantics = [], scalar_prefetch = 0 : i64, scratch_operands = 3 : i64, tpu.core_type = #tpu.core_type<tc>} {
    %c0 = arith.constant 0 : index
    %c0_0 = arith.constant 0 : index
    %c0_1 = arith.constant 0 : index
    %0 = vector.load %arg0[%c0, %c0_0, %c0_1] : memref<8x8x32xf32, #tpu.memory_space<vmem>>, vector<8x8x32xf32>
    %cst = arith.constant dense<0.000000e+00> : vector<8x8xf32>
    %1 = vector.multi_reduction <add>, %0, %cst [2] : vector<8x8x32xf32> to vector<8x8xf32>
    %2 = vector.shape_cast %1 : vector<8x8xf32> to vector<8x8x1xf32>
    %cst_2 = arith.constant 3.200000e+01 : f32
    %3 = vector.broadcast %cst_2 : f32 to vector<8x8x1xf32>
    %4 = arith.divf %2, %3 : vector<8x8x1xf32>
    %5 = vector.broadcast %4 : vector<8x8x1xf32> to vector<8x8x32xf32>
    %6 = arith.subf %0, %5 : vector<8x8x32xf32>
    %7 = arith.mulf %6, %6 : vector<8x8x32xf32>
    %cst_3 = arith.constant dense<0.000000e+00> : vector<8x8xf32>
    %8 = vector.multi_reduction <add>, %7, %cst_3 [2] : vector<8x8x32xf32> to vector<8x8xf32>
    %9 = vector.shape_cast %8 : vector<8x8xf32> to vector<8x8x1xf32>
    %cst_4 = arith.constant 3.200000e+01 : f32
    %10 = vector.broadcast %cst_4 : f32 to vector<8x8x1xf32>
    %11 = arith.divf %9, %10 : vector<8x8x1xf32>
    %12 = vector.broadcast %4 : vector<8x8x1xf32> to vector<8x8x32xf32>
    %13 = arith.subf %0, %12 : vector<8x8x32xf32>
    %cst_5 = arith.constant 9.99999974E-6 : f32
    %14 = vector.broadcast %cst_5 : f32 to vector<8x8x1xf32>
    %15 = arith.addf %11, %14 : vector<8x8x1xf32>
    %16 = math.rsqrt %15 : vector<8x8x1xf32>
    %17 = vector.broadcast %16 : vector<8x8x1xf32> to vector<8x8x32xf32>
    %18 = arith.mulf %13, %17 : vector<8x8x32xf32>
    %c0_6 = arith.constant 0 : index
    %c0_7 = arith.constant 0 : index
    %19 = vector.load %arg1[%c0_6, %c0_7] : memref<1x32xf32, #tpu.memory_space<vmem>>, vector<1x32xf32>
    %20 = vector.shape_cast %19 : vector<1x32xf32> to vector<1x1x32xf32>
    %21 = vector.broadcast %20 : vector<1x1x32xf32> to vector<8x8x32xf32>
    %22 = arith.mulf %18, %21 : vector<8x8x32xf32>
    %c0_8 = arith.constant 0 : index
    %c0_9 = arith.constant 0 : index
    %23 = vector.load %arg2[%c0_8, %c0_9] : memref<1x32xf32, #tpu.memory_space<vmem>>, vector<1x32xf32>
    %24 = vector.shape_cast %23 : vector<1x32xf32> to vector<1x1x32xf32>
    %25 = vector.broadcast %24 : vector<1x1x32xf32> to vector<8x8x32xf32>
    %26 = arith.addf %22, %25 : vector<8x8x32xf32>
    %27 = vector.shape_cast %26 : vector<8x8x32xf32> to vector<64x32xf32>
    %c0_10 = arith.constant 0 : index
    %c0_11 = arith.constant 0 : index
    %28 = vector.load %arg3[%c0_10, %c0_11] : memref<32x256xf32, #tpu.memory_space<vmem>>, vector<32x256xf32>
    %cst_12 = arith.constant dense<0.000000e+00> : vector<64x256xf32>
    %29 = tpu.matmul %27, %28, %cst_12 {dimension_numbers = #tpu.dot_dimension_numbers<[1], [0], [0], [1], [0, 0, 1, 1], [], []>} : vector<64x32xf32>, vector<32x256xf32>, vector<64x256xf32> -> vector<64x256xf32>
    %c0_13 = arith.constant 0 : index
    %c0_14 = arith.constant 0 : index
    %30 = vector.load %arg5[%c0_13, %c0_14] : memref<1x256xf32, #tpu.memory_space<vmem>>, vector<1x256xf32>
    %31 = vector.broadcast %30 : vector<1x256xf32> to vector<64x256xf32>
    %32 = arith.addf %29, %31 : vector<64x256xf32>
    %33 = vector.shape_cast %32 : vector<64x256xf32> to vector<8x8x256xf32>
    %c0_15 = arith.constant 0 : index
    %c0_16 = arith.constant 0 : index
    %c0_17 = arith.constant 0 : index
    %34 = vector.load %arg9[%c0_15, %c0_16, %c0_17] : memref<8x8x256xf32, #tpu.memory_space<vmem>>, vector<8x8x256xf32>
    tpu.vector_store %arg9[%c0_15, %c0_16, %c0_17], %33 {strides = array<i32>} : memref<8x8x256xf32, #tpu.memory_space<vmem>>, vector<8x8x256xf32>,
    %cst_18 = arith.constant 0.000000e+00 : f32
    %35 = vector.broadcast %cst_18 : f32 to vector<8x64xf32>
    %c0_19 = arith.constant 0 : index
    %c0_20 = arith.constant 0 : index
    %36 = vector.load %arg10[%c0_19, %c0_20] : memref<8x64xf32, #tpu.memory_space<vmem>>, vector<8x64xf32>
    tpu.vector_store %arg10[%c0_19, %c0_20], %35 {strides = array<i32>} : memref<8x64xf32, #tpu.memory_space<vmem>>, vector<8x64xf32>,
    %cst_21 = arith.constant 0.000000e+00 : f32
    %37 = vector.broadcast %cst_21 : f32 to vector<8x64xf32>
    %c0_22 = arith.constant 0 : index
    %c0_23 = arith.constant 0 : index
    %38 = vector.load %arg11[%c0_22, %c0_23] : memref<8x64xf32, #tpu.memory_space<vmem>>, vector<8x64xf32>
    tpu.vector_store %arg11[%c0_22, %c0_23], %37 {strides = array<i32>} : memref<8x64xf32, #tpu.memory_space<vmem>>, vector<8x64xf32>,
    %c0_24 = arith.constant 0 : index
    %c0_25 = arith.constant 0 : index
    %39 = vector.load %arg6[%c0_24, %c0_25] : memref<8x1xi32, #tpu.memory_space<vmem>>, vector<8x1xi32>
    %40 = tpu.iota {dimensions = array<i32: 1>} : vector<8x256xi32>
    %c64_i32 = arith.constant 64 : i32
    %c0_i32 = arith.constant 0 : i32
    %41 = arith.cmpi eq, %c64_i32, %c0_i32 : i32
    %c1_i32 = arith.constant 1 : i32
    %42 = arith.select %41, %c1_i32, %c64_i32 : i32
    %43 = vector.broadcast %42 : i32 to vector<8x256xi32>
    %44 = arith.remsi %40, %43 : vector<8x256xi32>
    %c0_i32_26 = arith.constant 0 : i32
    %45 = vector.broadcast %c0_i32_26 : i32 to vector<8x256xi32>
    %46 = arith.cmpi ne, %44, %45 : vector<8x256xi32>
    %c0_i32_27 = arith.constant 0 : i32
    %47 = vector.broadcast %c0_i32_27 : i32 to vector<8x256xi32>
    %48 = arith.cmpi slt, %44, %47 : vector<8x256xi32>
    %c0_i32_28 = arith.constant 0 : i32
    %49 = arith.cmpi slt, %42, %c0_i32_28 : i32
    %50 = vector.broadcast %49 : i1 to vector<8x256xi1>
    %51 = vector.broadcast %50 : vector<8x256xi1> to vector<8x256xi1>
    %52 = arith.xori %48, %51 : vector<8x256xi1>
    %53 = arith.andi %52, %46 : vector<8x256xi1>
    %54 = vector.broadcast %42 : i32 to vector<8x256xi32>
    %55 = arith.addi %44, %54 : vector<8x256xi32>
    %56 = arith.select %53, %55, %44 : vector<8x256xi1>, vector<8x256xi32>
    %c32_i32 = arith.constant 32 : i32
    %57 = vector.broadcast %c32_i32 : i32 to vector<8x256xi32>
    %58 = arith.cmpi slt, %56, %57 : vector<8x256xi32>
    %59 = tpu.iota {dimensions = array<i32: 1>} : vector<8x64xi32>
    %c32_i32_29 = arith.constant 32 : i32
    %60 = vector.broadcast %c32_i32_29 : i32 to vector<8x64xi32>
    %61 = arith.cmpi slt, %59, %60 : vector<8x64xi32>
    %c0_i32_30 = arith.constant 0 : i32
    %c7_i32 = arith.constant 7 : i32
    %62 = arith.subi %c7_i32, %c0_i32_30 : i32
    %63 = arith.index_cast %c0_i32_30 : i32 to index
    %c0_31 = arith.constant 0 : index
    %c0_32 = arith.constant 0 : index
    %64 = vector.load %arg9[%63, %c0_31, %c0_32] : memref<8x8x256xf32, #tpu.memory_space<vmem>>, vector<1x8x256xf32>
    %65 = vector.shape_cast %64 : vector<1x8x256xf32> to vector<8x256xf32>
    %66 = arith.index_cast %62 : i32 to index
    %c0_33 = arith.constant 0 : index
    %c0_34 = arith.constant 0 : index
    %67 = vector.load %arg9[%66, %c0_33, %c0_34] : memref<8x8x256xf32, #tpu.memory_space<vmem>>, vector<1x8x256xf32>
    %68 = vector.shape_cast %67 : vector<1x8x256xf32> to vector<8x256xf32>
    %69 = arith.select %58, %65, %68 : vector<8x256xi1>, vector<8x256xf32>
    %c0_35 = arith.constant 0 : index
    %c0_36 = arith.constant 0 : index
    %70 = vector.load %arg10[%c0_35, %c0_36] : memref<8x64xf32, #tpu.memory_space<vmem>>, vector<8x64xf32>
    %c0_37 = arith.constant 0 : index
    %c0_38 = arith.constant 0 : index
    %71 = vector.load %arg4[%c0_37, %c0_38] : memref<64x256xf32, #tpu.memory_space<vmem>>, vector<64x256xf32>
    %cst_39 = arith.constant dense<0.000000e+00> : vector<8x256xf32>
    %72 = tpu.matmul %70, %71, %cst_39 {dimension_numbers = #tpu.dot_dimension_numbers<[1], [0], [0], [1], [0, 0, 1, 1], [], []>} : vector<8x64xf32>, vector<64x256xf32>, vector<8x256xf32> -> vector<8x256xf32>
    %73 = arith.addf %69, %72 : vector<8x256xf32>
    %74 = vector.extract_strided_slice %73 {offsets = [0, 0], sizes = [8, 64], strides = [1, 1]} : vector<8x256xf32> to vector<8x64xf32>
    %75 = arith.negf %74 : vector<8x64xf32>
    %76 = math.exp %75 : vector<8x64xf32>
    %cst_40 = arith.constant 1.000000e+00 : f32
    %77 = vector.broadcast %cst_40 : f32 to vector<8x64xf32>
    %78 = arith.addf %77, %76 : vector<8x64xf32>
    %79 = arith.divf %77, %78 : vector<8x64xf32>
    %80 = vector.extract_strided_slice %73 {offsets = [0, 64], sizes = [8, 64], strides = [1, 1]} : vector<8x256xf32> to vector<8x64xf32>
    %81 = arith.negf %80 : vector<8x64xf32>
    %82 = math.exp %81 : vector<8x64xf32>
    %cst_41 = arith.constant 1.000000e+00 : f32
    %83 = vector.broadcast %cst_41 : f32 to vector<8x64xf32>
    %84 = arith.addf %83, %82 : vector<8x64xf32>
    %85 = arith.divf %83, %84 : vector<8x64xf32>
    %86 = vector.extract_strided_slice %73 {offsets = [0, 128], sizes = [8, 64], strides = [1, 1]} : vector<8x256xf32> to vector<8x64xf32>
    %87 = math.tanh %86 : vector<8x64xf32>
    %88 = vector.extract_strided_slice %73 {offsets = [0, 192], sizes = [8, 64], strides = [1, 1]} : vector<8x256xf32> to vector<8x64xf32>
    %89 = arith.negf %88 : vector<8x64xf32>
    %90 = math.exp %89 : vector<8x64xf32>
    %cst_42 = arith.constant 1.000000e+00 : f32
    %91 = vector.broadcast %cst_42 : f32 to vector<8x64xf32>
    %92 = arith.addf %91, %90 : vector<8x64xf32>
    %93 = arith.divf %91, %92 : vector<8x64xf32>
    %c0_43 = arith.constant 0 : index
    %c0_44 = arith.constant 0 : index
    %94 = vector.load %arg11[%c0_43, %c0_44] : memref<8x64xf32, #tpu.memory_space<vmem>>, vector<8x64xf32>
    %95 = arith.mulf %85, %94 : vector<8x64xf32>
    %96 = arith.mulf %79, %87 : vector<8x64xf32>
    %97 = arith.addf %95, %96 : vector<8x64xf32>
    %98 = math.tanh %97 : vector<8x64xf32>
    %99 = arith.mulf %93, %98 : vector<8x64xf32>
    %100 = vector.broadcast %c0_i32_30 : i32 to vector<8x1xi32>
    %101 = arith.cmpi slt, %100, %39 : vector<8x1xi32>
    %102 = vector.broadcast %62 : i32 to vector<8x1xi32>
    %103 = arith.cmpi slt, %102, %39 : vector<8x1xi32>
    %104 = vector.broadcast %c0_i32_30 : i32 to vector<8x64xi32>
    %105 = vector.broadcast %62 : i32 to vector<8x64xi32>
    %106 = arith.select %61, %104, %105 : vector<8x64xi1>, vector<8x64xi32>
    %107 = vector.broadcast %39 : vector<8x1xi32> to vector<8x64xi32>
    %108 = arith.cmpi slt, %106, %107 : vector<8x64xi32>
    %c0_45 = arith.constant 0 : index
    %c0_46 = arith.constant 0 : index
    %109 = vector.load %arg11[%c0_45, %c0_46] : memref<8x64xf32, #tpu.memory_space<vmem>>, vector<8x64xf32>
    %110 = arith.select %108, %97, %109 : vector<8x64xi1>, vector<8x64xf32>
    %c0_47 = arith.constant 0 : index
    %c0_48 = arith.constant 0 : index
    %111 = vector.load %arg11[%c0_47, %c0_48] : memref<8x64xf32, #tpu.memory_space<vmem>>, vector<8x64xf32>
    tpu.vector_store %arg11[%c0_47, %c0_48], %110 {strides = array<i32>} : memref<8x64xf32, #tpu.memory_space<vmem>>, vector<8x64xf32>,
    %c0_49 = arith.constant 0 : index
    %c0_50 = arith.constant 0 : index
    %112 = vector.load %arg10[%c0_49, %c0_50] : memref<8x64xf32, #tpu.memory_space<vmem>>, vector<8x64xf32>
    %113 = arith.select %108, %99, %112 : vector<8x64xi1>, vector<8x64xf32>
    %c0_51 = arith.constant 0 : index
    %c0_52 = arith.constant 0 : index
    %114 = vector.load %arg10[%c0_51, %c0_52] : memref<8x64xf32, #tpu.memory_space<vmem>>, vector<8x64xf32>
    tpu.vector_store %arg10[%c0_51, %c0_52], %113 {strides = array<i32>} : memref<8x64xf32, #tpu.memory_space<vmem>>, vector<8x64xf32>,
    %115 = vector.extract_strided_slice %99 {offsets = [0, 0], sizes = [8, 32], strides = [1, 1]} : vector<8x64xf32> to vector<8x32xf32>
    %cst_53 = arith.constant 0.000000e+00 : f32
    %116 = vector.shape_cast %101 : vector<8x1xi1> to vector<8x1xi1>
    %117 = vector.broadcast %116 : vector<8x1xi1> to vector<8x32xi1>
    %118 = vector.broadcast %cst_53 : f32 to vector<8x32xf32>
    %119 = arith.select %117, %115, %118 : vector<8x32xi1>, vector<8x32xf32>
    %120 = arith.index_cast %c0_i32_30 : i32 to index
    %c0_54 = arith.constant 0 : index
    %c0_55 = arith.constant 0 : index
    %121 = vector.load %arg7[%120, %c0_54, %c0_55] : memref<8x8x64xf32, #tpu.memory_space<vmem>>, vector<1x8x32xf32>
    %122 = vector.shape_cast %121 : vector<1x8x32xf32> to vector<8x32xf32>
    %123 = vector.shape_cast %119 : vector<8x32xf32> to vector<1x8x32xf32>
    tpu.vector_store %arg7[%120, %c0_54, %c0_55], %123 {strides = array<i32>} : memref<8x8x64xf32, #tpu.memory_space<vmem>>, vector<1x8x32xf32>,
    %124 = vector.extract_strided_slice %99 {offsets = [0, 32], sizes = [8, 32], strides = [1, 1]} : vector<8x64xf32> to vector<8x32xf32>
    %cst_56 = arith.constant 0.000000e+00 : f32
    %125 = vector.shape_cast %103 : vector<8x1xi1> to vector<8x1xi1>
    %126 = vector.broadcast %125 : vector<8x1xi1> to vector<8x32xi1>
    %127 = vector.broadcast %cst_56 : f32 to vector<8x32xf32>
    %128 = arith.select %126, %124, %127 : vector<8x32xi1>, vector<8x32xf32>
    %129 = arith.index_cast %62 : i32 to index
    %c0_57 = arith.constant 0 : index
    %c32 = arith.constant 32 : index
    %130 = vector.load %arg7[%129, %c0_57, %c32] : memref<8x8x64xf32, #tpu.memory_space<vmem>>, vector<1x8x32xf32>
    %131 = vector.shape_cast %130 : vector<1x8x32xf32> to vector<8x32xf32>
    %132 = vector.shape_cast %128 : vector<8x32xf32> to vector<1x8x32xf32>
    tpu.vector_store %arg7[%129, %c0_57, %c32], %132 {strides = array<i32>} : memref<8x8x64xf32, #tpu.memory_space<vmem>>, vector<1x8x32xf32>,
    %c1_i32_58 = arith.constant 1 : i32
    %c7_i32_59 = arith.constant 7 : i32
    %133 = arith.subi %c7_i32_59, %c1_i32_58 : i32
    %134 = arith.index_cast %c1_i32_58 : i32 to index
    %c0_60 = arith.constant 0 : index
    %c0_61 = arith.constant 0 : index
    %135 = vector.load %arg9[%134, %c0_60, %c0_61] : memref<8x8x256xf32, #tpu.memory_space<vmem>>, vector<1x8x256xf32>
    %136 = vector.shape_cast %135 : vector<1x8x256xf32> to vector<8x256xf32>
    %137 = arith.index_cast %133 : i32 to index
    %c0_62 = arith.constant 0 : index
    %c0_63 = arith.constant 0 : index
    %138 = vector.load %arg9[%137, %c0_62, %c0_63] : memref<8x8x256xf32, #tpu.memory_space<vmem>>, vector<1x8x256xf32>
    %139 = vector.shape_cast %138 : vector<1x8x256xf32> to vector<8x256xf32>
    %140 = arith.select %58, %136, %139 : vector<8x256xi1>, vector<8x256xf32>
    %c0_64 = arith.constant 0 : index
    %c0_65 = arith.constant 0 : index
    %141 = vector.load %arg10[%c0_64, %c0_65] : memref<8x64xf32, #tpu.memory_space<vmem>>, vector<8x64xf32>
    %c0_66 = arith.constant 0 : index
    %c0_67 = arith.constant 0 : index
    %142 = vector.load %arg4[%c0_66, %c0_67] : memref<64x256xf32, #tpu.memory_space<vmem>>, vector<64x256xf32>
    %cst_68 = arith.constant dense<0.000000e+00> : vector<8x256xf32>
    %143 = tpu.matmul %141, %142, %cst_68 {dimension_numbers = #tpu.dot_dimension_numbers<[1], [0], [0], [1], [0, 0, 1, 1], [], []>} : vector<8x64xf32>, vector<64x256xf32>, vector<8x256xf32> -> vector<8x256xf32>
    %144 = arith.addf %140, %143 : vector<8x256xf32>
    %145 = vector.extract_strided_slice %144 {offsets = [0, 0], sizes = [8, 64], strides = [1, 1]} : vector<8x256xf32> to vector<8x64xf32>
    %146 = arith.negf %145 : vector<8x64xf32>
    %147 = math.exp %146 : vector<8x64xf32>
    %cst_69 = arith.constant 1.000000e+00 : f32
    %148 = vector.broadcast %cst_69 : f32 to vector<8x64xf32>
    %149 = arith.addf %148, %147 : vector<8x64xf32>
    %150 = arith.divf %148, %149 : vector<8x64xf32>
    %151 = vector.extract_strided_slice %144 {offsets = [0, 64], sizes = [8, 64], strides = [1, 1]} : vector<8x256xf32> to vector<8x64xf32>
    %152 = arith.negf %151 : vector<8x64xf32>
    %153 = math.exp %152 : vector<8x64xf32>
    %cst_70 = arith.constant 1.000000e+00 : f32
    %154 = vector.broadcast %cst_70 : f32 to vector<8x64xf32>
    %155 = arith.addf %154, %153 : vector<8x64xf32>
    %156 = arith.divf %154, %155 : vector<8x64xf32>
    %157 = vector.extract_strided_slice %144 {offsets = [0, 128], sizes = [8, 64], strides = [1, 1]} : vector<8x256xf32> to vector<8x64xf32>
    %158 = math.tanh %157 : vector<8x64xf32>
    %159 = vector.extract_strided_slice %144 {offsets = [0, 192], sizes = [8, 64], strides = [1, 1]} : vector<8x256xf32> to vector<8x64xf32>
    %160 = arith.negf %159 : vector<8x64xf32>
    %161 = math.exp %160 : vector<8x64xf32>
    %cst_71 = arith.constant 1.000000e+00 : f32
    %162 = vector.broadcast %cst_71 : f32 to vector<8x64xf32>
    %163 = arith.addf %162, %161 : vector<8x64xf32>
    %164 = arith.divf %162, %163 : vector<8x64xf32>
    %c0_72 = arith.constant 0 : index
    %c0_73 = arith.constant 0 : index
    %165 = vector.load %arg11[%c0_72, %c0_73] : memref<8x64xf32, #tpu.memory_space<vmem>>, vector<8x64xf32>
    %166 = arith.mulf %156, %165 : vector<8x64xf32>
    %167 = arith.mulf %150, %158 : vector<8x64xf32>
    %168 = arith.addf %166, %167 : vector<8x64xf32>
    %169 = math.tanh %168 : vector<8x64xf32>
    %170 = arith.mulf %164, %169 : vector<8x64xf32>
    %171 = vector.broadcast %c1_i32_58 : i32 to vector<8x1xi32>
    %172 = arith.cmpi slt, %171, %39 : vector<8x1xi32>
    %173 = vector.broadcast %133 : i32 to vector<8x1xi32>
    %174 = arith.cmpi slt, %173, %39 : vector<8x1xi32>
    %175 = vector.broadcast %c1_i32_58 : i32 to vector<8x64xi32>
    %176 = vector.broadcast %133 : i32 to vector<8x64xi32>
    %177 = arith.select %61, %175, %176 : vector<8x64xi1>, vector<8x64xi32>
    %178 = vector.broadcast %39 : vector<8x1xi32> to vector<8x64xi32>
    %179 = arith.cmpi slt, %177, %178 : vector<8x64xi32>
    %c0_74 = arith.constant 0 : index
    %c0_75 = arith.constant 0 : index
    %180 = vector.load %arg11[%c0_74, %c0_75] : memref<8x64xf32, #tpu.memory_space<vmem>>, vector<8x64xf32>
    %181 = arith.select %179, %168, %180 : vector<8x64xi1>, vector<8x64xf32>
    %c0_76 = arith.constant 0 : index
    %c0_77 = arith.constant 0 : index
    %182 = vector.load %arg11[%c0_76, %c0_77] : memref<8x64xf32, #tpu.memory_space<vmem>>, vector<8x64xf32>
    tpu.vector_store %arg11[%c0_76, %c0_77], %181 {strides = array<i32>} : memref<8x64xf32, #tpu.memory_space<vmem>>, vector<8x64xf32>,
    %c0_78 = arith.constant 0 : index
    %c0_79 = arith.constant 0 : index
    %183 = vector.load %arg10[%c0_78, %c0_79] : memref<8x64xf32, #tpu.memory_space<vmem>>, vector<8x64xf32>
    %184 = arith.select %179, %170, %183 : vector<8x64xi1>, vector<8x64xf32>
    %c0_80 = arith.constant 0 : index
    %c0_81 = arith.constant 0 : index
    %185 = vector.load %arg10[%c0_80, %c0_81] : memref<8x64xf32, #tpu.memory_space<vmem>>, vector<8x64xf32>
    tpu.vector_store %arg10[%c0_80, %c0_81], %184 {strides = array<i32>} : memref<8x64xf32, #tpu.memory_space<vmem>>, vector<8x64xf32>,
    %186 = vector.extract_strided_slice %170 {offsets = [0, 0], sizes = [8, 32], strides = [1, 1]} : vector<8x64xf32> to vector<8x32xf32>
    %cst_82 = arith.constant 0.000000e+00 : f32
    %187 = vector.shape_cast %172 : vector<8x1xi1> to vector<8x1xi1>
    %188 = vector.broadcast %187 : vector<8x1xi1> to vector<8x32xi1>
    %189 = vector.broadcast %cst_82 : f32 to vector<8x32xf32>
    %190 = arith.select %188, %186, %189 : vector<8x32xi1>, vector<8x32xf32>
    %191 = arith.index_cast %c1_i32_58 : i32 to index
    %c0_83 = arith.constant 0 : index
    %c0_84 = arith.constant 0 : index
    %192 = vector.load %arg7[%191, %c0_83, %c0_84] : memref<8x8x64xf32, #tpu.memory_space<vmem>>, vector<1x8x32xf32>
    %193 = vector.shape_cast %192 : vector<1x8x32xf32> to vector<8x32xf32>
    %194 = vector.shape_cast %190 : vector<8x32xf32> to vector<1x8x32xf32>
    tpu.vector_store %arg7[%191, %c0_83, %c0_84], %194 {strides = array<i32>} : memref<8x8x64xf32, #tpu.memory_space<vmem>>, vector<1x8x32xf32>,
    %195 = vector.extract_strided_slice %170 {offsets = [0, 32], sizes = [8, 32], strides = [1, 1]} : vector<8x64xf32> to vector<8x32xf32>
    %cst_85 = arith.constant 0.000000e+00 : f32
    %196 = vector.shape_cast %174 : vector<8x1xi1> to vector<8x1xi1>
    %197 = vector.broadcast %196 : vector<8x1xi1> to vector<8x32xi1>
    %198 = vector.broadcast %cst_85 : f32 to vector<8x32xf32>
    %199 = arith.select %197, %195, %198 : vector<8x32xi1>, vector<8x32xf32>
    %200 = arith.index_cast %133 : i32 to index
    %c0_86 = arith.constant 0 : index
    %c32_87 = arith.constant 32 : index
    %201 = vector.load %arg7[%200, %c0_86, %c32_87] : memref<8x8x64xf32, #tpu.memory_space<vmem>>, vector<1x8x32xf32>
    %202 = vector.shape_cast %201 : vector<1x8x32xf32> to vector<8x32xf32>
    %203 = vector.shape_cast %199 : vector<8x32xf32> to vector<1x8x32xf32>
    tpu.vector_store %arg7[%200, %c0_86, %c32_87], %203 {strides = array<i32>} : memref<8x8x64xf32, #tpu.memory_space<vmem>>, vector<1x8x32xf32>,
    %c2_i32 = arith.constant 2 : i32
    %c7_i32_88 = arith.constant 7 : i32
    %204 = arith.subi %c7_i32_88, %c2_i32 : i32
    %205 = arith.index_cast %c2_i32 : i32 to index
    %c0_89 = arith.constant 0 : index
    %c0_90 = arith.constant 0 : index
    %206 = vector.load %arg9[%205, %c0_89, %c0_90] : memref<8x8x256xf32, #tpu.memory_space<vmem>>, vector<1x8x256xf32>
    %207 = vector.shape_cast %206 : vector<1x8x256xf32> to vector<8x256xf32>
    %208 = arith.index_cast %204 : i32 to index
    %c0_91 = arith.constant 0 : index
    %c0_92 = arith.constant 0 : index
    %209 = vector.load %arg9[%208, %c0_91, %c0_92] : memref<8x8x256xf32, #tpu.memory_space<vmem>>, vector<1x8x256xf32>
    %210 = vector.shape_cast %209 : vector<1x8x256xf32> to vector<8x256xf32>
    %211 = arith.select %58, %207, %210 : vector<8x256xi1>, vector<8x256xf32>
    %c0_93 = arith.constant 0 : index
    %c0_94 = arith.constant 0 : index
    %212 = vector.load %arg10[%c0_93, %c0_94] : memref<8x64xf32, #tpu.memory_space<vmem>>, vector<8x64xf32>
    %c0_95 = arith.constant 0 : index
    %c0_96 = arith.constant 0 : index
    %213 = vector.load %arg4[%c0_95, %c0_96] : memref<64x256xf32, #tpu.memory_space<vmem>>, vector<64x256xf32>
    %cst_97 = arith.constant dense<0.000000e+00> : vector<8x256xf32>
    %214 = tpu.matmul %212, %213, %cst_97 {dimension_numbers = #tpu.dot_dimension_numbers<[1], [0], [0], [1], [0, 0, 1, 1], [], []>} : vector<8x64xf32>, vector<64x256xf32>, vector<8x256xf32> -> vector<8x256xf32>
    %215 = arith.addf %211, %214 : vector<8x256xf32>
    %216 = vector.extract_strided_slice %215 {offsets = [0, 0], sizes = [8, 64], strides = [1, 1]} : vector<8x256xf32> to vector<8x64xf32>
    %217 = arith.negf %216 : vector<8x64xf32>
    %218 = math.exp %217 : vector<8x64xf32>
    %cst_98 = arith.constant 1.000000e+00 : f32
    %219 = vector.broadcast %cst_98 : f32 to vector<8x64xf32>
    %220 = arith.addf %219, %218 : vector<8x64xf32>
    %221 = arith.divf %219, %220 : vector<8x64xf32>
    %222 = vector.extract_strided_slice %215 {offsets = [0, 64], sizes = [8, 64], strides = [1, 1]} : vector<8x256xf32> to vector<8x64xf32>
    %223 = arith.negf %222 : vector<8x64xf32>
    %224 = math.exp %223 : vector<8x64xf32>
    %cst_99 = arith.constant 1.000000e+00 : f32
    %225 = vector.broadcast %cst_99 : f32 to vector<8x64xf32>
    %226 = arith.addf %225, %224 : vector<8x64xf32>
    %227 = arith.divf %225, %226 : vector<8x64xf32>
    %228 = vector.extract_strided_slice %215 {offsets = [0, 128], sizes = [8, 64], strides = [1, 1]} : vector<8x256xf32> to vector<8x64xf32>
    %229 = math.tanh %228 : vector<8x64xf32>
    %230 = vector.extract_strided_slice %215 {offsets = [0, 192], sizes = [8, 64], strides = [1, 1]} : vector<8x256xf32> to vector<8x64xf32>
    %231 = arith.negf %230 : vector<8x64xf32>
    %232 = math.exp %231 : vector<8x64xf32>
    %cst_100 = arith.constant 1.000000e+00 : f32
    %233 = vector.broadcast %cst_100 : f32 to vector<8x64xf32>
    %234 = arith.addf %233, %232 : vector<8x64xf32>
    %235 = arith.divf %233, %234 : vector<8x64xf32>
    %c0_101 = arith.constant 0 : index
    %c0_102 = arith.constant 0 : index
    %236 = vector.load %arg11[%c0_101, %c0_102] : memref<8x64xf32, #tpu.memory_space<vmem>>, vector<8x64xf32>
    %237 = arith.mulf %227, %236 : vector<8x64xf32>
    %238 = arith.mulf %221, %229 : vector<8x64xf32>
    %239 = arith.addf %237, %238 : vector<8x64xf32>
    %240 = math.tanh %239 : vector<8x64xf32>
    %241 = arith.mulf %235, %240 : vector<8x64xf32>
    %242 = vector.broadcast %c2_i32 : i32 to vector<8x1xi32>
    %243 = arith.cmpi slt, %242, %39 : vector<8x1xi32>
    %244 = vector.broadcast %204 : i32 to vector<8x1xi32>
    %245 = arith.cmpi slt, %244, %39 : vector<8x1xi32>
    %246 = vector.broadcast %c2_i32 : i32 to vector<8x64xi32>
    %247 = vector.broadcast %204 : i32 to vector<8x64xi32>
    %248 = arith.select %61, %246, %247 : vector<8x64xi1>, vector<8x64xi32>
    %249 = vector.broadcast %39 : vector<8x1xi32> to vector<8x64xi32>
    %250 = arith.cmpi slt, %248, %249 : vector<8x64xi32>
    %c0_103 = arith.constant 0 : index
    %c0_104 = arith.constant 0 : index
    %251 = vector.load %arg11[%c0_103, %c0_104] : memref<8x64xf32, #tpu.memory_space<vmem>>, vector<8x64xf32>
    %252 = arith.select %250, %239, %251 : vector<8x64xi1>, vector<8x64xf32>
    %c0_105 = arith.constant 0 : index
    %c0_106 = arith.constant 0 : index
    %253 = vector.load %arg11[%c0_105, %c0_106] : memref<8x64xf32, #tpu.memory_space<vmem>>, vector<8x64xf32>
    tpu.vector_store %arg11[%c0_105, %c0_106], %252 {strides = array<i32>} : memref<8x64xf32, #tpu.memory_space<vmem>>, vector<8x64xf32>,
    %c0_107 = arith.constant 0 : index
    %c0_108 = arith.constant 0 : index
    %254 = vector.load %arg10[%c0_107, %c0_108] : memref<8x64xf32, #tpu.memory_space<vmem>>, vector<8x64xf32>
    %255 = arith.select %250, %241, %254 : vector<8x64xi1>, vector<8x64xf32>
    %c0_109 = arith.constant 0 : index
    %c0_110 = arith.constant 0 : index
    %256 = vector.load %arg10[%c0_109, %c0_110] : memref<8x64xf32, #tpu.memory_space<vmem>>, vector<8x64xf32>
    tpu.vector_store %arg10[%c0_109, %c0_110], %255 {strides = array<i32>} : memref<8x64xf32, #tpu.memory_space<vmem>>, vector<8x64xf32>,
    %257 = vector.extract_strided_slice %241 {offsets = [0, 0], sizes = [8, 32], strides = [1, 1]} : vector<8x64xf32> to vector<8x32xf32>
    %cst_111 = arith.constant 0.000000e+00 : f32
    %258 = vector.shape_cast %243 : vector<8x1xi1> to vector<8x1xi1>
    %259 = vector.broadcast %258 : vector<8x1xi1> to vector<8x32xi1>
    %260 = vector.broadcast %cst_111 : f32 to vector<8x32xf32>
    %261 = arith.select %259, %257, %260 : vector<8x32xi1>, vector<8x32xf32>
    %262 = arith.index_cast %c2_i32 : i32 to index
    %c0_112 = arith.constant 0 : index
    %c0_113 = arith.constant 0 : index
    %263 = vector.load %arg7[%262, %c0_112, %c0_113] : memref<8x8x64xf32, #tpu.memory_space<vmem>>, vector<1x8x32xf32>
    %264 = vector.shape_cast %263 : vector<1x8x32xf32> to vector<8x32xf32>
    %265 = vector.shape_cast %261 : vector<8x32xf32> to vector<1x8x32xf32>
    tpu.vector_store %arg7[%262, %c0_112, %c0_113], %265 {strides = array<i32>} : memref<8x8x64xf32, #tpu.memory_space<vmem>>, vector<1x8x32xf32>,
    %266 = vector.extract_strided_slice %241 {offsets = [0, 32], sizes = [8, 32], strides = [1, 1]} : vector<8x64xf32> to vector<8x32xf32>
    %cst_114 = arith.constant 0.000000e+00 : f32
    %267 = vector.shape_cast %245 : vector<8x1xi1> to vector<8x1xi1>
    %268 = vector.broadcast %267 : vector<8x1xi1> to vector<8x32xi1>
    %269 = vector.broadcast %cst_114 : f32 to vector<8x32xf32>
    %270 = arith.select %268, %266, %269 : vector<8x32xi1>, vector<8x32xf32>
    %271 = arith.index_cast %204 : i32 to index
    %c0_115 = arith.constant 0 : index
    %c32_116 = arith.constant 32 : index
    %272 = vector.load %arg7[%271, %c0_115, %c32_116] : memref<8x8x64xf32, #tpu.memory_space<vmem>>, vector<1x8x32xf32>
    %273 = vector.shape_cast %272 : vector<1x8x32xf32> to vector<8x32xf32>
    %274 = vector.shape_cast %270 : vector<8x32xf32> to vector<1x8x32xf32>
    tpu.vector_store %arg7[%271, %c0_115, %c32_116], %274 {strides = array<i32>} : memref<8x8x64xf32, #tpu.memory_space<vmem>>, vector<1x8x32xf32>,
    %c3_i32 = arith.constant 3 : i32
    %c7_i32_117 = arith.constant 7 : i32
    %275 = arith.subi %c7_i32_117, %c3_i32 : i32
    %276 = arith.index_cast %c3_i32 : i32 to index
    %c0_118 = arith.constant 0 : index
    %c0_119 = arith.constant 0 : index
    %277 = vector.load %arg9[%276, %c0_118, %c0_119] : memref<8x8x256xf32, #tpu.memory_space<vmem>>, vector<1x8x256xf32>
    %278 = vector.shape_cast %277 : vector<1x8x256xf32> to vector<8x256xf32>
    %279 = arith.index_cast %275 : i32 to index
    %c0_120 = arith.constant 0 : index
    %c0_121 = arith.constant 0 : index
    %280 = vector.load %arg9[%279, %c0_120, %c0_121] : memref<8x8x256xf32, #tpu.memory_space<vmem>>, vector<1x8x256xf32>
    %281 = vector.shape_cast %280 : vector<1x8x256xf32> to vector<8x256xf32>
    %282 = arith.select %58, %278, %281 : vector<8x256xi1>, vector<8x256xf32>
    %c0_122 = arith.constant 0 : index
    %c0_123 = arith.constant 0 : index
    %283 = vector.load %arg10[%c0_122, %c0_123] : memref<8x64xf32, #tpu.memory_space<vmem>>, vector<8x64xf32>
    %c0_124 = arith.constant 0 : index
    %c0_125 = arith.constant 0 : index
    %284 = vector.load %arg4[%c0_124, %c0_125] : memref<64x256xf32, #tpu.memory_space<vmem>>, vector<64x256xf32>
    %cst_126 = arith.constant dense<0.000000e+00> : vector<8x256xf32>
    %285 = tpu.matmul %283, %284, %cst_126 {dimension_numbers = #tpu.dot_dimension_numbers<[1], [0], [0], [1], [0, 0, 1, 1], [], []>} : vector<8x64xf32>, vector<64x256xf32>, vector<8x256xf32> -> vector<8x256xf32>
    %286 = arith.addf %282, %285 : vector<8x256xf32>
    %287 = vector.extract_strided_slice %286 {offsets = [0, 0], sizes = [8, 64], strides = [1, 1]} : vector<8x256xf32> to vector<8x64xf32>
    %288 = arith.negf %287 : vector<8x64xf32>
    %289 = math.exp %288 : vector<8x64xf32>
    %cst_127 = arith.constant 1.000000e+00 : f32
    %290 = vector.broadcast %cst_127 : f32 to vector<8x64xf32>
    %291 = arith.addf %290, %289 : vector<8x64xf32>
    %292 = arith.divf %290, %291 : vector<8x64xf32>
    %293 = vector.extract_strided_slice %286 {offsets = [0, 64], sizes = [8, 64], strides = [1, 1]} : vector<8x256xf32> to vector<8x64xf32>
    %294 = arith.negf %293 : vector<8x64xf32>
    %295 = math.exp %294 : vector<8x64xf32>
    %cst_128 = arith.constant 1.000000e+00 : f32
    %296 = vector.broadcast %cst_128 : f32 to vector<8x64xf32>
    %297 = arith.addf %296, %295 : vector<8x64xf32>
    %298 = arith.divf %296, %297 : vector<8x64xf32>
    %299 = vector.extract_strided_slice %286 {offsets = [0, 128], sizes = [8, 64], strides = [1, 1]} : vector<8x256xf32> to vector<8x64xf32>
    %300 = math.tanh %299 : vector<8x64xf32>
    %301 = vector.extract_strided_slice %286 {offsets = [0, 192], sizes = [8, 64], strides = [1, 1]} : vector<8x256xf32> to vector<8x64xf32>
    %302 = arith.negf %301 : vector<8x64xf32>
    %303 = math.exp %302 : vector<8x64xf32>
    %cst_129 = arith.constant 1.000000e+00 : f32
    %304 = vector.broadcast %cst_129 : f32 to vector<8x64xf32>
    %305 = arith.addf %304, %303 : vector<8x64xf32>
    %306 = arith.divf %304, %305 : vector<8x64xf32>
    %c0_130 = arith.constant 0 : index
    %c0_131 = arith.constant 0 : index
    %307 = vector.load %arg11[%c0_130, %c0_131] : memref<8x64xf32, #tpu.memory_space<vmem>>, vector<8x64xf32>
    %308 = arith.mulf %298, %307 : vector<8x64xf32>
    %309 = arith.mulf %292, %300 : vector<8x64xf32>
    %310 = arith.addf %308, %309 : vector<8x64xf32>
    %311 = math.tanh %310 : vector<8x64xf32>
    %312 = arith.mulf %306, %311 : vector<8x64xf32>
    %313 = vector.broadcast %c3_i32 : i32 to vector<8x1xi32>
    %314 = arith.cmpi slt, %313, %39 : vector<8x1xi32>
    %315 = vector.broadcast %275 : i32 to vector<8x1xi32>
    %316 = arith.cmpi slt, %315, %39 : vector<8x1xi32>
    %317 = vector.broadcast %c3_i32 : i32 to vector<8x64xi32>
    %318 = vector.broadcast %275 : i32 to vector<8x64xi32>
    %319 = arith.select %61, %317, %318 : vector<8x64xi1>, vector<8x64xi32>
    %320 = vector.broadcast %39 : vector<8x1xi32> to vector<8x64xi32>
    %321 = arith.cmpi slt, %319, %320 : vector<8x64xi32>
    %c0_132 = arith.constant 0 : index
    %c0_133 = arith.constant 0 : index
    %322 = vector.load %arg11[%c0_132, %c0_133] : memref<8x64xf32, #tpu.memory_space<vmem>>, vector<8x64xf32>
    %323 = arith.select %321, %310, %322 : vector<8x64xi1>, vector<8x64xf32>
    %c0_134 = arith.constant 0 : index
    %c0_135 = arith.constant 0 : index
    %324 = vector.load %arg11[%c0_134, %c0_135] : memref<8x64xf32, #tpu.memory_space<vmem>>, vector<8x64xf32>
    tpu.vector_store %arg11[%c0_134, %c0_135], %323 {strides = array<i32>} : memref<8x64xf32, #tpu.memory_space<vmem>>, vector<8x64xf32>,
    %c0_136 = arith.constant 0 : index
    %c0_137 = arith.constant 0 : index
    %325 = vector.load %arg10[%c0_136, %c0_137] : memref<8x64xf32, #tpu.memory_space<vmem>>, vector<8x64xf32>
    %326 = arith.select %321, %312, %325 : vector<8x64xi1>, vector<8x64xf32>
    %c0_138 = arith.constant 0 : index
    %c0_139 = arith.constant 0 : index
    %327 = vector.load %arg10[%c0_138, %c0_139] : memref<8x64xf32, #tpu.memory_space<vmem>>, vector<8x64xf32>
    tpu.vector_store %arg10[%c0_138, %c0_139], %326 {strides = array<i32>} : memref<8x64xf32, #tpu.memory_space<vmem>>, vector<8x64xf32>,
    %328 = vector.extract_strided_slice %312 {offsets = [0, 0], sizes = [8, 32], strides = [1, 1]} : vector<8x64xf32> to vector<8x32xf32>
    %cst_140 = arith.constant 0.000000e+00 : f32
    %329 = vector.shape_cast %314 : vector<8x1xi1> to vector<8x1xi1>
    %330 = vector.broadcast %329 : vector<8x1xi1> to vector<8x32xi1>
    %331 = vector.broadcast %cst_140 : f32 to vector<8x32xf32>
    %332 = arith.select %330, %328, %331 : vector<8x32xi1>, vector<8x32xf32>
    %333 = arith.index_cast %c3_i32 : i32 to index
    %c0_141 = arith.constant 0 : index
    %c0_142 = arith.constant 0 : index
    %334 = vector.load %arg7[%333, %c0_141, %c0_142] : memref<8x8x64xf32, #tpu.memory_space<vmem>>, vector<1x8x32xf32>
    %335 = vector.shape_cast %334 : vector<1x8x32xf32> to vector<8x32xf32>
    %336 = vector.shape_cast %332 : vector<8x32xf32> to vector<1x8x32xf32>
    tpu.vector_store %arg7[%333, %c0_141, %c0_142], %336 {strides = array<i32>} : memref<8x8x64xf32, #tpu.memory_space<vmem>>, vector<1x8x32xf32>,
    %337 = vector.extract_strided_slice %312 {offsets = [0, 32], sizes = [8, 32], strides = [1, 1]} : vector<8x64xf32> to vector<8x32xf32>
    %cst_143 = arith.constant 0.000000e+00 : f32
    %338 = vector.shape_cast %316 : vector<8x1xi1> to vector<8x1xi1>
    %339 = vector.broadcast %338 : vector<8x1xi1> to vector<8x32xi1>
    %340 = vector.broadcast %cst_143 : f32 to vector<8x32xf32>
    %341 = arith.select %339, %337, %340 : vector<8x32xi1>, vector<8x32xf32>
    %342 = arith.index_cast %275 : i32 to index
    %c0_144 = arith.constant 0 : index
    %c32_145 = arith.constant 32 : index
    %343 = vector.load %arg7[%342, %c0_144, %c32_145] : memref<8x8x64xf32, #tpu.memory_space<vmem>>, vector<1x8x32xf32>
    %344 = vector.shape_cast %343 : vector<1x8x32xf32> to vector<8x32xf32>
    %345 = vector.shape_cast %341 : vector<8x32xf32> to vector<1x8x32xf32>
    tpu.vector_store %arg7[%342, %c0_144, %c32_145], %345 {strides = array<i32>} : memref<8x8x64xf32, #tpu.memory_space<vmem>>, vector<1x8x32xf32>,
    %c4_i32 = arith.constant 4 : i32
    %c7_i32_146 = arith.constant 7 : i32
    %346 = arith.subi %c7_i32_146, %c4_i32 : i32
    %347 = arith.index_cast %c4_i32 : i32 to index
    %c0_147 = arith.constant 0 : index
    %c0_148 = arith.constant 0 : index
    %348 = vector.load %arg9[%347, %c0_147, %c0_148] : memref<8x8x256xf32, #tpu.memory_space<vmem>>, vector<1x8x256xf32>
    %349 = vector.shape_cast %348 : vector<1x8x256xf32> to vector<8x256xf32>
    %350 = arith.index_cast %346 : i32 to index
    %c0_149 = arith.constant 0 : index
    %c0_150 = arith.constant 0 : index
    %351 = vector.load %arg9[%350, %c0_149, %c0_150] : memref<8x8x256xf32, #tpu.memory_space<vmem>>, vector<1x8x256xf32>
    %352 = vector.shape_cast %351 : vector<1x8x256xf32> to vector<8x256xf32>
    %353 = arith.select %58, %349, %352 : vector<8x256xi1>, vector<8x256xf32>
    %c0_151 = arith.constant 0 : index
    %c0_152 = arith.constant 0 : index
    %354 = vector.load %arg10[%c0_151, %c0_152] : memref<8x64xf32, #tpu.memory_space<vmem>>, vector<8x64xf32>
    %c0_153 = arith.constant 0 : index
    %c0_154 = arith.constant 0 : index
    %355 = vector.load %arg4[%c0_153, %c0_154] : memref<64x256xf32, #tpu.memory_space<vmem>>, vector<64x256xf32>
    %cst_155 = arith.constant dense<0.000000e+00> : vector<8x256xf32>
    %356 = tpu.matmul %354, %355, %cst_155 {dimension_numbers = #tpu.dot_dimension_numbers<[1], [0], [0], [1], [0, 0, 1, 1], [], []>} : vector<8x64xf32>, vector<64x256xf32>, vector<8x256xf32> -> vector<8x256xf32>
    %357 = arith.addf %353, %356 : vector<8x256xf32>
    %358 = vector.extract_strided_slice %357 {offsets = [0, 0], sizes = [8, 64], strides = [1, 1]} : vector<8x256xf32> to vector<8x64xf32>
    %359 = arith.negf %358 : vector<8x64xf32>
    %360 = math.exp %359 : vector<8x64xf32>
    %cst_156 = arith.constant 1.000000e+00 : f32
    %361 = vector.broadcast %cst_156 : f32 to vector<8x64xf32>
    %362 = arith.addf %361, %360 : vector<8x64xf32>
    %363 = arith.divf %361, %362 : vector<8x64xf32>
    %364 = vector.extract_strided_slice %357 {offsets = [0, 64], sizes = [8, 64], strides = [1, 1]} : vector<8x256xf32> to vector<8x64xf32>
    %365 = arith.negf %364 : vector<8x64xf32>
    %366 = math.exp %365 : vector<8x64xf32>
    %cst_157 = arith.constant 1.000000e+00 : f32
    %367 = vector.broadcast %cst_157 : f32 to vector<8x64xf32>
    %368 = arith.addf %367, %366 : vector<8x64xf32>
    %369 = arith.divf %367, %368 : vector<8x64xf32>
    %370 = vector.extract_strided_slice %357 {offsets = [0, 128], sizes = [8, 64], strides = [1, 1]} : vector<8x256xf32> to vector<8x64xf32>
    %371 = math.tanh %370 : vector<8x64xf32>
    %372 = vector.extract_strided_slice %357 {offsets = [0, 192], sizes = [8, 64], strides = [1, 1]} : vector<8x256xf32> to vector<8x64xf32>
    %373 = arith.negf %372 : vector<8x64xf32>
    %374 = math.exp %373 : vector<8x64xf32>
    %cst_158 = arith.constant 1.000000e+00 : f32
    %375 = vector.broadcast %cst_158 : f32 to vector<8x64xf32>
    %376 = arith.addf %375, %374 : vector<8x64xf32>
    %377 = arith.divf %375, %376 : vector<8x64xf32>
    %c0_159 = arith.constant 0 : index
    %c0_160 = arith.constant 0 : index
    %378 = vector.load %arg11[%c0_159, %c0_160] : memref<8x64xf32, #tpu.memory_space<vmem>>, vector<8x64xf32>
    %379 = arith.mulf %369, %378 : vector<8x64xf32>
    %380 = arith.mulf %363, %371 : vector<8x64xf32>
    %381 = arith.addf %379, %380 : vector<8x64xf32>
    %382 = math.tanh %381 : vector<8x64xf32>
    %383 = arith.mulf %377, %382 : vector<8x64xf32>
    %384 = vector.broadcast %c4_i32 : i32 to vector<8x1xi32>
    %385 = arith.cmpi slt, %384, %39 : vector<8x1xi32>
    %386 = vector.broadcast %346 : i32 to vector<8x1xi32>
    %387 = arith.cmpi slt, %386, %39 : vector<8x1xi32>
    %388 = vector.broadcast %c4_i32 : i32 to vector<8x64xi32>
    %389 = vector.broadcast %346 : i32 to vector<8x64xi32>
    %390 = arith.select %61, %388, %389 : vector<8x64xi1>, vector<8x64xi32>
    %391 = vector.broadcast %39 : vector<8x1xi32> to vector<8x64xi32>
    %392 = arith.cmpi slt, %390, %391 : vector<8x64xi32>
    %c0_161 = arith.constant 0 : index
    %c0_162 = arith.constant 0 : index
    %393 = vector.load %arg11[%c0_161, %c0_162] : memref<8x64xf32, #tpu.memory_space<vmem>>, vector<8x64xf32>
    %394 = arith.select %392, %381, %393 : vector<8x64xi1>, vector<8x64xf32>
    %c0_163 = arith.constant 0 : index
    %c0_164 = arith.constant 0 : index
    %395 = vector.load %arg11[%c0_163, %c0_164] : memref<8x64xf32, #tpu.memory_space<vmem>>, vector<8x64xf32>
    tpu.vector_store %arg11[%c0_163, %c0_164], %394 {strides = array<i32>} : memref<8x64xf32, #tpu.memory_space<vmem>>, vector<8x64xf32>,
    %c0_165 = arith.constant 0 : index
    %c0_166 = arith.constant 0 : index
    %396 = vector.load %arg10[%c0_165, %c0_166] : memref<8x64xf32, #tpu.memory_space<vmem>>, vector<8x64xf32>
    %397 = arith.select %392, %383, %396 : vector<8x64xi1>, vector<8x64xf32>
    %c0_167 = arith.constant 0 : index
    %c0_168 = arith.constant 0 : index
    %398 = vector.load %arg10[%c0_167, %c0_168] : memref<8x64xf32, #tpu.memory_space<vmem>>, vector<8x64xf32>
    tpu.vector_store %arg10[%c0_167, %c0_168], %397 {strides = array<i32>} : memref<8x64xf32, #tpu.memory_space<vmem>>, vector<8x64xf32>,
    %399 = vector.extract_strided_slice %383 {offsets = [0, 0], sizes = [8, 32], strides = [1, 1]} : vector<8x64xf32> to vector<8x32xf32>
    %cst_169 = arith.constant 0.000000e+00 : f32
    %400 = vector.shape_cast %385 : vector<8x1xi1> to vector<8x1xi1>
    %401 = vector.broadcast %400 : vector<8x1xi1> to vector<8x32xi1>
    %402 = vector.broadcast %cst_169 : f32 to vector<8x32xf32>
    %403 = arith.select %401, %399, %402 : vector<8x32xi1>, vector<8x32xf32>
    %404 = arith.index_cast %c4_i32 : i32 to index
    %c0_170 = arith.constant 0 : index
    %c0_171 = arith.constant 0 : index
    %405 = vector.load %arg7[%404, %c0_170, %c0_171] : memref<8x8x64xf32, #tpu.memory_space<vmem>>, vector<1x8x32xf32>
    %406 = vector.shape_cast %405 : vector<1x8x32xf32> to vector<8x32xf32>
    %407 = vector.shape_cast %403 : vector<8x32xf32> to vector<1x8x32xf32>
    tpu.vector_store %arg7[%404, %c0_170, %c0_171], %407 {strides = array<i32>} : memref<8x8x64xf32, #tpu.memory_space<vmem>>, vector<1x8x32xf32>,
    %408 = vector.extract_strided_slice %383 {offsets = [0, 32], sizes = [8, 32], strides = [1, 1]} : vector<8x64xf32> to vector<8x32xf32>
    %cst_172 = arith.constant 0.000000e+00 : f32
    %409 = vector.shape_cast %387 : vector<8x1xi1> to vector<8x1xi1>
    %410 = vector.broadcast %409 : vector<8x1xi1> to vector<8x32xi1>
    %411 = vector.broadcast %cst_172 : f32 to vector<8x32xf32>
    %412 = arith.select %410, %408, %411 : vector<8x32xi1>, vector<8x32xf32>
    %413 = arith.index_cast %346 : i32 to index
    %c0_173 = arith.constant 0 : index
    %c32_174 = arith.constant 32 : index
    %414 = vector.load %arg7[%413, %c0_173, %c32_174] : memref<8x8x64xf32, #tpu.memory_space<vmem>>, vector<1x8x32xf32>
    %415 = vector.shape_cast %414 : vector<1x8x32xf32> to vector<8x32xf32>
    %416 = vector.shape_cast %412 : vector<8x32xf32> to vector<1x8x32xf32>
    tpu.vector_store %arg7[%413, %c0_173, %c32_174], %416 {strides = array<i32>} : memref<8x8x64xf32, #tpu.memory_space<vmem>>, vector<1x8x32xf32>,
    %c5_i32 = arith.constant 5 : i32
    %c7_i32_175 = arith.constant 7 : i32
    %417 = arith.subi %c7_i32_175, %c5_i32 : i32
    %418 = arith.index_cast %c5_i32 : i32 to index
    %c0_176 = arith.constant 0 : index
    %c0_177 = arith.constant 0 : index
    %419 = vector.load %arg9[%418, %c0_176, %c0_177] : memref<8x8x256xf32, #tpu.memory_space<vmem>>, vector<1x8x256xf32>
    %420 = vector.shape_cast %419 : vector<1x8x256xf32> to vector<8x256xf32>
    %421 = arith.index_cast %417 : i32 to index
    %c0_178 = arith.constant 0 : index
    %c0_179 = arith.constant 0 : index
    %422 = vector.load %arg9[%421, %c0_178, %c0_179] : memref<8x8x256xf32, #tpu.memory_space<vmem>>, vector<1x8x256xf32>
    %423 = vector.shape_cast %422 : vector<1x8x256xf32> to vector<8x256xf32>
    %424 = arith.select %58, %420, %423 : vector<8x256xi1>, vector<8x256xf32>
    %c0_180 = arith.constant 0 : index
    %c0_181 = arith.constant 0 : index
    %425 = vector.load %arg10[%c0_180, %c0_181] : memref<8x64xf32, #tpu.memory_space<vmem>>, vector<8x64xf32>
    %c0_182 = arith.constant 0 : index
    %c0_183 = arith.constant 0 : index
    %426 = vector.load %arg4[%c0_182, %c0_183] : memref<64x256xf32, #tpu.memory_space<vmem>>, vector<64x256xf32>
    %cst_184 = arith.constant dense<0.000000e+00> : vector<8x256xf32>
    %427 = tpu.matmul %425, %426, %cst_184 {dimension_numbers = #tpu.dot_dimension_numbers<[1], [0], [0], [1], [0, 0, 1, 1], [], []>} : vector<8x64xf32>, vector<64x256xf32>, vector<8x256xf32> -> vector<8x256xf32>
    %428 = arith.addf %424, %427 : vector<8x256xf32>
    %429 = vector.extract_strided_slice %428 {offsets = [0, 0], sizes = [8, 64], strides = [1, 1]} : vector<8x256xf32> to vector<8x64xf32>
    %430 = arith.negf %429 : vector<8x64xf32>
    %431 = math.exp %430 : vector<8x64xf32>
    %cst_185 = arith.constant 1.000000e+00 : f32
    %432 = vector.broadcast %cst_185 : f32 to vector<8x64xf32>
    %433 = arith.addf %432, %431 : vector<8x64xf32>
    %434 = arith.divf %432, %433 : vector<8x64xf32>
    %435 = vector.extract_strided_slice %428 {offsets = [0, 64], sizes = [8, 64], strides = [1, 1]} : vector<8x256xf32> to vector<8x64xf32>
    %436 = arith.negf %435 : vector<8x64xf32>
    %437 = math.exp %436 : vector<8x64xf32>
    %cst_186 = arith.constant 1.000000e+00 : f32
    %438 = vector.broadcast %cst_186 : f32 to vector<8x64xf32>
    %439 = arith.addf %438, %437 : vector<8x64xf32>
    %440 = arith.divf %438, %439 : vector<8x64xf32>
    %441 = vector.extract_strided_slice %428 {offsets = [0, 128], sizes = [8, 64], strides = [1, 1]} : vector<8x256xf32> to vector<8x64xf32>
    %442 = math.tanh %441 : vector<8x64xf32>
    %443 = vector.extract_strided_slice %428 {offsets = [0, 192], sizes = [8, 64], strides = [1, 1]} : vector<8x256xf32> to vector<8x64xf32>
    %444 = arith.negf %443 : vector<8x64xf32>
    %445 = math.exp %444 : vector<8x64xf32>
    %cst_187 = arith.constant 1.000000e+00 : f32
    %446 = vector.broadcast %cst_187 : f32 to vector<8x64xf32>
    %447 = arith.addf %446, %445 : vector<8x64xf32>
    %448 = arith.divf %446, %447 : vector<8x64xf32>
    %c0_188 = arith.constant 0 : index
    %c0_189 = arith.constant 0 : index
    %449 = vector.load %arg11[%c0_188, %c0_189] : memref<8x64xf32, #tpu.memory_space<vmem>>, vector<8x64xf32>
    %450 = arith.mulf %440, %449 : vector<8x64xf32>
    %451 = arith.mulf %434, %442 : vector<8x64xf32>
    %452 = arith.addf %450, %451 : vector<8x64xf32>
    %453 = math.tanh %452 : vector<8x64xf32>
    %454 = arith.mulf %448, %453 : vector<8x64xf32>
    %455 = vector.broadcast %c5_i32 : i32 to vector<8x1xi32>
    %456 = arith.cmpi slt, %455, %39 : vector<8x1xi32>
    %457 = vector.broadcast %417 : i32 to vector<8x1xi32>
    %458 = arith.cmpi slt, %457, %39 : vector<8x1xi32>
    %459 = vector.broadcast %c5_i32 : i32 to vector<8x64xi32>
    %460 = vector.broadcast %417 : i32 to vector<8x64xi32>
    %461 = arith.select %61, %459, %460 : vector<8x64xi1>, vector<8x64xi32>
    %462 = vector.broadcast %39 : vector<8x1xi32> to vector<8x64xi32>
    %463 = arith.cmpi slt, %461, %462 : vector<8x64xi32>
    %c0_190 = arith.constant 0 : index
    %c0_191 = arith.constant 0 : index
    %464 = vector.load %arg11[%c0_190, %c0_191] : memref<8x64xf32, #tpu.memory_space<vmem>>, vector<8x64xf32>
    %465 = arith.select %463, %452, %464 : vector<8x64xi1>, vector<8x64xf32>
    %c0_192 = arith.constant 0 : index
    %c0_193 = arith.constant 0 : index
    %466 = vector.load %arg11[%c0_192, %c0_193] : memref<8x64xf32, #tpu.memory_space<vmem>>, vector<8x64xf32>
    tpu.vector_store %arg11[%c0_192, %c0_193], %465 {strides = array<i32>} : memref<8x64xf32, #tpu.memory_space<vmem>>, vector<8x64xf32>,
    %c0_194 = arith.constant 0 : index
    %c0_195 = arith.constant 0 : index
    %467 = vector.load %arg10[%c0_194, %c0_195] : memref<8x64xf32, #tpu.memory_space<vmem>>, vector<8x64xf32>
    %468 = arith.select %463, %454, %467 : vector<8x64xi1>, vector<8x64xf32>
    %c0_196 = arith.constant 0 : index
    %c0_197 = arith.constant 0 : index
    %469 = vector.load %arg10[%c0_196, %c0_197] : memref<8x64xf32, #tpu.memory_space<vmem>>, vector<8x64xf32>
    tpu.vector_store %arg10[%c0_196, %c0_197], %468 {strides = array<i32>} : memref<8x64xf32, #tpu.memory_space<vmem>>, vector<8x64xf32>,
    %470 = vector.extract_strided_slice %454 {offsets = [0, 0], sizes = [8, 32], strides = [1, 1]} : vector<8x64xf32> to vector<8x32xf32>
    %cst_198 = arith.constant 0.000000e+00 : f32
    %471 = vector.shape_cast %456 : vector<8x1xi1> to vector<8x1xi1>
    %472 = vector.broadcast %471 : vector<8x1xi1> to vector<8x32xi1>
    %473 = vector.broadcast %cst_198 : f32 to vector<8x32xf32>
    %474 = arith.select %472, %470, %473 : vector<8x32xi1>, vector<8x32xf32>
    %475 = arith.index_cast %c5_i32 : i32 to index
    %c0_199 = arith.constant 0 : index
    %c0_200 = arith.constant 0 : index
    %476 = vector.load %arg7[%475, %c0_199, %c0_200] : memref<8x8x64xf32, #tpu.memory_space<vmem>>, vector<1x8x32xf32>
    %477 = vector.shape_cast %476 : vector<1x8x32xf32> to vector<8x32xf32>
    %478 = vector.shape_cast %474 : vector<8x32xf32> to vector<1x8x32xf32>
    tpu.vector_store %arg7[%475, %c0_199, %c0_200], %478 {strides = array<i32>} : memref<8x8x64xf32, #tpu.memory_space<vmem>>, vector<1x8x32xf32>,
    %479 = vector.extract_strided_slice %454 {offsets = [0, 32], sizes = [8, 32], strides = [1, 1]} : vector<8x64xf32> to vector<8x32xf32>
    %cst_201 = arith.constant 0.000000e+00 : f32
    %480 = vector.shape_cast %458 : vector<8x1xi1> to vector<8x1xi1>
    %481 = vector.broadcast %480 : vector<8x1xi1> to vector<8x32xi1>
    %482 = vector.broadcast %cst_201 : f32 to vector<8x32xf32>
    %483 = arith.select %481, %479, %482 : vector<8x32xi1>, vector<8x32xf32>
    %484 = arith.index_cast %417 : i32 to index
    %c0_202 = arith.constant 0 : index
    %c32_203 = arith.constant 32 : index
    %485 = vector.load %arg7[%484, %c0_202, %c32_203] : memref<8x8x64xf32, #tpu.memory_space<vmem>>, vector<1x8x32xf32>
    %486 = vector.shape_cast %485 : vector<1x8x32xf32> to vector<8x32xf32>
    %487 = vector.shape_cast %483 : vector<8x32xf32> to vector<1x8x32xf32>
    tpu.vector_store %arg7[%484, %c0_202, %c32_203], %487 {strides = array<i32>} : memref<8x8x64xf32, #tpu.memory_space<vmem>>, vector<1x8x32xf32>,
    %c6_i32 = arith.constant 6 : i32
    %c7_i32_204 = arith.constant 7 : i32
    %488 = arith.subi %c7_i32_204, %c6_i32 : i32
    %489 = arith.index_cast %c6_i32 : i32 to index
    %c0_205 = arith.constant 0 : index
    %c0_206 = arith.constant 0 : index
    %490 = vector.load %arg9[%489, %c0_205, %c0_206] : memref<8x8x256xf32, #tpu.memory_space<vmem>>, vector<1x8x256xf32>
    %491 = vector.shape_cast %490 : vector<1x8x256xf32> to vector<8x256xf32>
    %492 = arith.index_cast %488 : i32 to index
    %c0_207 = arith.constant 0 : index
    %c0_208 = arith.constant 0 : index
    %493 = vector.load %arg9[%492, %c0_207, %c0_208] : memref<8x8x256xf32, #tpu.memory_space<vmem>>, vector<1x8x256xf32>
    %494 = vector.shape_cast %493 : vector<1x8x256xf32> to vector<8x256xf32>
    %495 = arith.select %58, %491, %494 : vector<8x256xi1>, vector<8x256xf32>
    %c0_209 = arith.constant 0 : index
    %c0_210 = arith.constant 0 : index
    %496 = vector.load %arg10[%c0_209, %c0_210] : memref<8x64xf32, #tpu.memory_space<vmem>>, vector<8x64xf32>
    %c0_211 = arith.constant 0 : index
    %c0_212 = arith.constant 0 : index
    %497 = vector.load %arg4[%c0_211, %c0_212] : memref<64x256xf32, #tpu.memory_space<vmem>>, vector<64x256xf32>
    %cst_213 = arith.constant dense<0.000000e+00> : vector<8x256xf32>
    %498 = tpu.matmul %496, %497, %cst_213 {dimension_numbers = #tpu.dot_dimension_numbers<[1], [0], [0], [1], [0, 0, 1, 1], [], []>} : vector<8x64xf32>, vector<64x256xf32>, vector<8x256xf32> -> vector<8x256xf32>
    %499 = arith.addf %495, %498 : vector<8x256xf32>
    %500 = vector.extract_strided_slice %499 {offsets = [0, 0], sizes = [8, 64], strides = [1, 1]} : vector<8x256xf32> to vector<8x64xf32>
    %501 = arith.negf %500 : vector<8x64xf32>
    %502 = math.exp %501 : vector<8x64xf32>
    %cst_214 = arith.constant 1.000000e+00 : f32
    %503 = vector.broadcast %cst_214 : f32 to vector<8x64xf32>
    %504 = arith.addf %503, %502 : vector<8x64xf32>
    %505 = arith.divf %503, %504 : vector<8x64xf32>
    %506 = vector.extract_strided_slice %499 {offsets = [0, 64], sizes = [8, 64], strides = [1, 1]} : vector<8x256xf32> to vector<8x64xf32>
    %507 = arith.negf %506 : vector<8x64xf32>
    %508 = math.exp %507 : vector<8x64xf32>
    %cst_215 = arith.constant 1.000000e+00 : f32
    %509 = vector.broadcast %cst_215 : f32 to vector<8x64xf32>
    %510 = arith.addf %509, %508 : vector<8x64xf32>
    %511 = arith.divf %509, %510 : vector<8x64xf32>
    %512 = vector.extract_strided_slice %499 {offsets = [0, 128], sizes = [8, 64], strides = [1, 1]} : vector<8x256xf32> to vector<8x64xf32>
    %513 = math.tanh %512 : vector<8x64xf32>
    %514 = vector.extract_strided_slice %499 {offsets = [0, 192], sizes = [8, 64], strides = [1, 1]} : vector<8x256xf32> to vector<8x64xf32>
    %515 = arith.negf %514 : vector<8x64xf32>
    %516 = math.exp %515 : vector<8x64xf32>
    %cst_216 = arith.constant 1.000000e+00 : f32
    %517 = vector.broadcast %cst_216 : f32 to vector<8x64xf32>
    %518 = arith.addf %517, %516 : vector<8x64xf32>
    %519 = arith.divf %517, %518 : vector<8x64xf32>
    %c0_217 = arith.constant 0 : index
    %c0_218 = arith.constant 0 : index
    %520 = vector.load %arg11[%c0_217, %c0_218] : memref<8x64xf32, #tpu.memory_space<vmem>>, vector<8x64xf32>
    %521 = arith.mulf %511, %520 : vector<8x64xf32>
    %522 = arith.mulf %505, %513 : vector<8x64xf32>
    %523 = arith.addf %521, %522 : vector<8x64xf32>
    %524 = math.tanh %523 : vector<8x64xf32>
    %525 = arith.mulf %519, %524 : vector<8x64xf32>
    %526 = vector.broadcast %c6_i32 : i32 to vector<8x1xi32>
    %527 = arith.cmpi slt, %526, %39 : vector<8x1xi32>
    %528 = vector.broadcast %488 : i32 to vector<8x1xi32>
    %529 = arith.cmpi slt, %528, %39 : vector<8x1xi32>
    %530 = vector.broadcast %c6_i32 : i32 to vector<8x64xi32>
    %531 = vector.broadcast %488 : i32 to vector<8x64xi32>
    %532 = arith.select %61, %530, %531 : vector<8x64xi1>, vector<8x64xi32>
    %533 = vector.broadcast %39 : vector<8x1xi32> to vector<8x64xi32>
    %534 = arith.cmpi slt, %532, %533 : vector<8x64xi32>
    %c0_219 = arith.constant 0 : index
    %c0_220 = arith.constant 0 : index
    %535 = vector.load %arg11[%c0_219, %c0_220] : memref<8x64xf32, #tpu.memory_space<vmem>>, vector<8x64xf32>
    %536 = arith.select %534, %523, %535 : vector<8x64xi1>, vector<8x64xf32>
    %c0_221 = arith.constant 0 : index
    %c0_222 = arith.constant 0 : index
    %537 = vector.load %arg11[%c0_221, %c0_222] : memref<8x64xf32, #tpu.memory_space<vmem>>, vector<8x64xf32>
    tpu.vector_store %arg11[%c0_221, %c0_222], %536 {strides = array<i32>} : memref<8x64xf32, #tpu.memory_space<vmem>>, vector<8x64xf32>,
    %c0_223 = arith.constant 0 : index
    %c0_224 = arith.constant 0 : index
    %538 = vector.load %arg10[%c0_223, %c0_224] : memref<8x64xf32, #tpu.memory_space<vmem>>, vector<8x64xf32>
    %539 = arith.select %534, %525, %538 : vector<8x64xi1>, vector<8x64xf32>
    %c0_225 = arith.constant 0 : index
    %c0_226 = arith.constant 0 : index
    %540 = vector.load %arg10[%c0_225, %c0_226] : memref<8x64xf32, #tpu.memory_space<vmem>>, vector<8x64xf32>
    tpu.vector_store %arg10[%c0_225, %c0_226], %539 {strides = array<i32>} : memref<8x64xf32, #tpu.memory_space<vmem>>, vector<8x64xf32>,
    %541 = vector.extract_strided_slice %525 {offsets = [0, 0], sizes = [8, 32], strides = [1, 1]} : vector<8x64xf32> to vector<8x32xf32>
    %cst_227 = arith.constant 0.000000e+00 : f32
    %542 = vector.shape_cast %527 : vector<8x1xi1> to vector<8x1xi1>
    %543 = vector.broadcast %542 : vector<8x1xi1> to vector<8x32xi1>
    %544 = vector.broadcast %cst_227 : f32 to vector<8x32xf32>
    %545 = arith.select %543, %541, %544 : vector<8x32xi1>, vector<8x32xf32>
    %546 = arith.index_cast %c6_i32 : i32 to index
    %c0_228 = arith.constant 0 : index
    %c0_229 = arith.constant 0 : index
    %547 = vector.load %arg7[%546, %c0_228, %c0_229] : memref<8x8x64xf32, #tpu.memory_space<vmem>>, vector<1x8x32xf32>
    %548 = vector.shape_cast %547 : vector<1x8x32xf32> to vector<8x32xf32>
    %549 = vector.shape_cast %545 : vector<8x32xf32> to vector<1x8x32xf32>
    tpu.vector_store %arg7[%546, %c0_228, %c0_229], %549 {strides = array<i32>} : memref<8x8x64xf32, #tpu.memory_space<vmem>>, vector<1x8x32xf32>,
    %550 = vector.extract_strided_slice %525 {offsets = [0, 32], sizes = [8, 32], strides = [1, 1]} : vector<8x64xf32> to vector<8x32xf32>
    %cst_230 = arith.constant 0.000000e+00 : f32
    %551 = vector.shape_cast %529 : vector<8x1xi1> to vector<8x1xi1>
    %552 = vector.broadcast %551 : vector<8x1xi1> to vector<8x32xi1>
    %553 = vector.broadcast %cst_230 : f32 to vector<8x32xf32>
    %554 = arith.select %552, %550, %553 : vector<8x32xi1>, vector<8x32xf32>
    %555 = arith.index_cast %488 : i32 to index
    %c0_231 = arith.constant 0 : index
    %c32_232 = arith.constant 32 : index
    %556 = vector.load %arg7[%555, %c0_231, %c32_232] : memref<8x8x64xf32, #tpu.memory_space<vmem>>, vector<1x8x32xf32>
    %557 = vector.shape_cast %556 : vector<1x8x32xf32> to vector<8x32xf32>
    %558 = vector.shape_cast %554 : vector<8x32xf32> to vector<1x8x32xf32>
    tpu.vector_store %arg7[%555, %c0_231, %c32_232], %558 {strides = array<i32>} : memref<8x8x64xf32, #tpu.memory_space<vmem>>, vector<1x8x32xf32>,
    %c7_i32_233 = arith.constant 7 : i32
    %c7_i32_234 = arith.constant 7 : i32
    %559 = arith.subi %c7_i32_234, %c7_i32_233 : i32
    %560 = arith.index_cast %c7_i32_233 : i32 to index
    %c0_235 = arith.constant 0 : index
    %c0_236 = arith.constant 0 : index
    %561 = vector.load %arg9[%560, %c0_235, %c0_236] : memref<8x8x256xf32, #tpu.memory_space<vmem>>, vector<1x8x256xf32>
    %562 = vector.shape_cast %561 : vector<1x8x256xf32> to vector<8x256xf32>
    %563 = arith.index_cast %559 : i32 to index
    %c0_237 = arith.constant 0 : index
    %c0_238 = arith.constant 0 : index
    %564 = vector.load %arg9[%563, %c0_237, %c0_238] : memref<8x8x256xf32, #tpu.memory_space<vmem>>, vector<1x8x256xf32>
    %565 = vector.shape_cast %564 : vector<1x8x256xf32> to vector<8x256xf32>
    %566 = arith.select %58, %562, %565 : vector<8x256xi1>, vector<8x256xf32>
    %c0_239 = arith.constant 0 : index
    %c0_240 = arith.constant 0 : index
    %567 = vector.load %arg10[%c0_239, %c0_240] : memref<8x64xf32, #tpu.memory_space<vmem>>, vector<8x64xf32>
    %c0_241 = arith.constant 0 : index
    %c0_242 = arith.constant 0 : index
    %568 = vector.load %arg4[%c0_241, %c0_242] : memref<64x256xf32, #tpu.memory_space<vmem>>, vector<64x256xf32>
    %cst_243 = arith.constant dense<0.000000e+00> : vector<8x256xf32>
    %569 = tpu.matmul %567, %568, %cst_243 {dimension_numbers = #tpu.dot_dimension_numbers<[1], [0], [0], [1], [0, 0, 1, 1], [], []>} : vector<8x64xf32>, vector<64x256xf32>, vector<8x256xf32> -> vector<8x256xf32>
    %570 = arith.addf %566, %569 : vector<8x256xf32>
    %571 = vector.extract_strided_slice %570 {offsets = [0, 0], sizes = [8, 64], strides = [1, 1]} : vector<8x256xf32> to vector<8x64xf32>
    %572 = arith.negf %571 : vector<8x64xf32>
    %573 = math.exp %572 : vector<8x64xf32>
    %cst_244 = arith.constant 1.000000e+00 : f32
    %574 = vector.broadcast %cst_244 : f32 to vector<8x64xf32>
    %575 = arith.addf %574, %573 : vector<8x64xf32>
    %576 = arith.divf %574, %575 : vector<8x64xf32>
    %577 = vector.extract_strided_slice %570 {offsets = [0, 64], sizes = [8, 64], strides = [1, 1]} : vector<8x256xf32> to vector<8x64xf32>
    %578 = arith.negf %577 : vector<8x64xf32>
    %579 = math.exp %578 : vector<8x64xf32>
    %cst_245 = arith.constant 1.000000e+00 : f32
    %580 = vector.broadcast %cst_245 : f32 to vector<8x64xf32>
    %581 = arith.addf %580, %579 : vector<8x64xf32>
    %582 = arith.divf %580, %581 : vector<8x64xf32>
    %583 = vector.extract_strided_slice %570 {offsets = [0, 128], sizes = [8, 64], strides = [1, 1]} : vector<8x256xf32> to vector<8x64xf32>
    %584 = math.tanh %583 : vector<8x64xf32>
    %585 = vector.extract_strided_slice %570 {offsets = [0, 192], sizes = [8, 64], strides = [1, 1]} : vector<8x256xf32> to vector<8x64xf32>
    %586 = arith.negf %585 : vector<8x64xf32>
    %587 = math.exp %586 : vector<8x64xf32>
    %cst_246 = arith.constant 1.000000e+00 : f32
    %588 = vector.broadcast %cst_246 : f32 to vector<8x64xf32>
    %589 = arith.addf %588, %587 : vector<8x64xf32>
    %590 = arith.divf %588, %589 : vector<8x64xf32>
    %c0_247 = arith.constant 0 : index
    %c0_248 = arith.constant 0 : index
    %591 = vector.load %arg11[%c0_247, %c0_248] : memref<8x64xf32, #tpu.memory_space<vmem>>, vector<8x64xf32>
    %592 = arith.mulf %582, %591 : vector<8x64xf32>
    %593 = arith.mulf %576, %584 : vector<8x64xf32>
    %594 = arith.addf %592, %593 : vector<8x64xf32>
    %595 = math.tanh %594 : vector<8x64xf32>
    %596 = arith.mulf %590, %595 : vector<8x64xf32>
    %597 = vector.broadcast %c7_i32_233 : i32 to vector<8x1xi32>
    %598 = arith.cmpi slt, %597, %39 : vector<8x1xi32>
    %599 = vector.broadcast %559 : i32 to vector<8x1xi32>
    %600 = arith.cmpi slt, %599, %39 : vector<8x1xi32>
    %601 = vector.broadcast %c7_i32_233 : i32 to vector<8x64xi32>
    %602 = vector.broadcast %559 : i32 to vector<8x64xi32>
    %603 = arith.select %61, %601, %602 : vector<8x64xi1>, vector<8x64xi32>
    %604 = vector.broadcast %39 : vector<8x1xi32> to vector<8x64xi32>
    %605 = arith.cmpi slt, %603, %604 : vector<8x64xi32>
    %c0_249 = arith.constant 0 : index
    %c0_250 = arith.constant 0 : index
    %606 = vector.load %arg11[%c0_249, %c0_250] : memref<8x64xf32, #tpu.memory_space<vmem>>, vector<8x64xf32>
    %607 = arith.select %605, %594, %606 : vector<8x64xi1>, vector<8x64xf32>
    %c0_251 = arith.constant 0 : index
    %c0_252 = arith.constant 0 : index
    %608 = vector.load %arg11[%c0_251, %c0_252] : memref<8x64xf32, #tpu.memory_space<vmem>>, vector<8x64xf32>
    tpu.vector_store %arg11[%c0_251, %c0_252], %607 {strides = array<i32>} : memref<8x64xf32, #tpu.memory_space<vmem>>, vector<8x64xf32>,
    %c0_253 = arith.constant 0 : index
    %c0_254 = arith.constant 0 : index
    %609 = vector.load %arg10[%c0_253, %c0_254] : memref<8x64xf32, #tpu.memory_space<vmem>>, vector<8x64xf32>
    %610 = arith.select %605, %596, %609 : vector<8x64xi1>, vector<8x64xf32>
    %c0_255 = arith.constant 0 : index
    %c0_256 = arith.constant 0 : index
    %611 = vector.load %arg10[%c0_255, %c0_256] : memref<8x64xf32, #tpu.memory_space<vmem>>, vector<8x64xf32>
    tpu.vector_store %arg10[%c0_255, %c0_256], %610 {strides = array<i32>} : memref<8x64xf32, #tpu.memory_space<vmem>>, vector<8x64xf32>,
    %612 = vector.extract_strided_slice %596 {offsets = [0, 0], sizes = [8, 32], strides = [1, 1]} : vector<8x64xf32> to vector<8x32xf32>
    %cst_257 = arith.constant 0.000000e+00 : f32
    %613 = vector.shape_cast %598 : vector<8x1xi1> to vector<8x1xi1>
    %614 = vector.broadcast %613 : vector<8x1xi1> to vector<8x32xi1>
    %615 = vector.broadcast %cst_257 : f32 to vector<8x32xf32>
    %616 = arith.select %614, %612, %615 : vector<8x32xi1>, vector<8x32xf32>
    %617 = arith.index_cast %c7_i32_233 : i32 to index
    %c0_258 = arith.constant 0 : index
    %c0_259 = arith.constant 0 : index
    %618 = vector.load %arg7[%617, %c0_258, %c0_259] : memref<8x8x64xf32, #tpu.memory_space<vmem>>, vector<1x8x32xf32>
    %619 = vector.shape_cast %618 : vector<1x8x32xf32> to vector<8x32xf32>
    %620 = vector.shape_cast %616 : vector<8x32xf32> to vector<1x8x32xf32>
    tpu.vector_store %arg7[%617, %c0_258, %c0_259], %620 {strides = array<i32>} : memref<8x8x64xf32, #tpu.memory_space<vmem>>, vector<1x8x32xf32>,
    %621 = vector.extract_strided_slice %596 {offsets = [0, 32], sizes = [8, 32], strides = [1, 1]} : vector<8x64xf32> to vector<8x32xf32>
    %cst_260 = arith.constant 0.000000e+00 : f32
    %622 = vector.shape_cast %600 : vector<8x1xi1> to vector<8x1xi1>
    %623 = vector.broadcast %622 : vector<8x1xi1> to vector<8x32xi1>
    %624 = vector.broadcast %cst_260 : f32 to vector<8x32xf32>
    %625 = arith.select %623, %621, %624 : vector<8x32xi1>, vector<8x32xf32>
    %626 = arith.index_cast %559 : i32 to index
    %c0_261 = arith.constant 0 : index
    %c32_262 = arith.constant 32 : index
    %627 = vector.load %arg7[%626, %c0_261, %c32_262] : memref<8x8x64xf32, #tpu.memory_space<vmem>>, vector<1x8x32xf32>
    %628 = vector.shape_cast %627 : vector<1x8x32xf32> to vector<8x32xf32>
    %629 = vector.shape_cast %625 : vector<8x32xf32> to vector<1x8x32xf32>
    tpu.vector_store %arg7[%626, %c0_261, %c32_262], %629 {strides = array<i32>} : memref<8x8x64xf32, #tpu.memory_space<vmem>>, vector<1x8x32xf32>,
    %c8_i32 = arith.constant 8 : i32
    %c0_263 = arith.constant 0 : index
    %c0_264 = arith.constant 0 : index
    %630 = vector.load %arg10[%c0_263, %c0_264] : memref<8x64xf32, #tpu.memory_space<vmem>>, vector<8x64xf32>
    %c0_265 = arith.constant 0 : index
    %c0_266 = arith.constant 0 : index
    %631 = vector.load %arg8[%c0_265, %c0_266] : memref<8x64xf32, #tpu.memory_space<vmem>>, vector<8x64xf32>
    tpu.vector_store %arg8[%c0_265, %c0_266], %630 {strides = array<i32>} : memref<8x64xf32, #tpu.memory_space<vmem>>, vector<8x64xf32>,
    return
  }
}

</mosaic_0001>

<bundles_post_ra>
// kernel: tpu_custom_call.1
= control target key start
LH: loop header
LB: loop body
LE: loop exit
PB: predicated region body
PF: predicated region fallthrough
CT: control target
= control target key end

     0   :  { %14 = vsyncpa [#allocation6], 0  ;;  %s2884_s0 = inlined_call_operand.hbm [shape: f32[8,8,32], index: 0, kind: input, shape index: {}]   ;;  %s2885_s1 = inlined_call_operand.vmem [shape: f32[1,32], index: 1, kind: input, shape index: {}]   ;;  %s2886_s2 = inlined_call_operand.vmem [shape: f32[1,32], index: 2, kind: input, shape index: {}]   ;;  %s2887_s3 = inlined_call_operand.hbm [shape: f32[32,256], index: 3, kind: input, shape index: {}]   ;;  %s2888_s4 = inlined_call_operand.hbm [shape: f32[64,256], index: 4, kind: input, shape index: {}]   ;;  %s2889_s5 = inlined_call_operand.vmem [shape: f32[1,256], index: 5, kind: input, shape index: {}]   ;;  %s2890_s6 = inlined_call_operand.vmem [shape: s32[8,1], index: 6, kind: input, shape index: {}]   ;;  %s2891_s7 = inlined_call_operand.hbm [shape: f32[8,8,64], index: 7, kind: output, shape index: {0}]   ;;  %s2892_s8 = inlined_call_operand.hbm [shape: f32[8,64], index: 8, kind: output, shape index: {1}]  }
   0x1   :  { %15 = vsyncpa [#allocation9], 0 }
   0x2   :  { %16 = vsyncpa [#allocation7], 0 }
   0x3   :  { %17 = vsyncpa [#allocation13], 0  ;;  %s2167_s27 = smov [#allocation8]   ;;  %s2049_s9 = scalar_lea.hbm %s2887_s3, 1024 }
   0x4   :  { %s39_s28 = sshll.u32 %s2167_s27, 4  ;;  %p2050_p0 = scmp.ne.s32.totalorder %s2887_s3, %s2049_s9  ;;  %s40_s28 = int_to_ptr.vmem [resolvable:$true] %s39_s28 }
   0x5   :  { %p2053_p1 = scmp.lt.u32.totalorder %s2049_s9, %s2887_s3 }
   0x7   :  { %p2055_p2 = pnand %p2053_p1, %p2050_p0 }
   0x9   :  { %2058 = shalt.err (!%p2055_p2)
}
   0xa   :  { %s2059_s14 = scalar_lea.vmem %s40_s28, 1024  ;;  %p2064_p4 = scmp.lt.s32.totalorder %s40_s28, %s40_s28 }
   0xb   :  { %p2060_p3 = scmp.ne.s32.totalorder %s40_s28, %s2059_s14  ;;  %p2065_p5 = scmp.lt.s32.totalorder %s2059_s14, %s2059_s14 }
   0xd   :  { %p2066_p6 = por %p2065_p5, %p2064_p4 }
   0xf   :  { %p2067_p7 = pnand %p2066_p6, %p2060_p3 }
  0x11   :  { %2070 = shalt.err (!%p2067_p7)
}
  0x12   :  { %s2168_s15 = smov 256   ;;  %s2169_s16 = smov 16  }
  0x13   :  { %45 = dma.hbm_to_vmem [thread:$0]  %s2887_s3, 1024, %s40_s28, [#allocation9], %s2168_s15, %s2168_s15, %s2169_s16  }
  0x14   :  { %s2170_s19 = smov [#allocation5]   ;;  %s2071_s23 = scalar_lea.hbm %s2884_s0, 1024 }
  0x15   :  { %s23_s20 = sshll.u32 %s2170_s19, 4  ;;  %p2072_p8 = scmp.ne.s32.totalorder %s2884_s0, %s2071_s23  ;;  %s24_s20 = int_to_ptr.vmem [resolvable:$true] %s23_s20 }
  0x16   :  { %p2075_p9 = scmp.lt.u32.totalorder %s2071_s23, %s2884_s0 }
  0x18   :  { %p2077_p10 = pnand %p2075_p9, %p2072_p8 }
  0x1a   :  { %2080 = shalt.err (!%p2077_p10)
}
  0x1b   :  { %s2081_s29 = scalar_lea.vmem %s24_s20, 1024  ;;  %p2086_p12 = scmp.lt.s32.totalorder %s24_s20, %s24_s20 }
  0x1c   :  { %p2082_p11 = scmp.ne.s32.totalorder %s24_s20, %s2081_s29  ;;  %p2087_p13 = scmp.lt.s32.totalorder %s2081_s29, %s2081_s29 }
  0x1e   :  { %p2088_p0 = por %p2087_p13, %p2086_p12 }
  0x20   :  { %p2089_p1 = pnand %p2088_p0, %p2082_p11 }
  0x22   :  { %2092 = shalt.err (!%p2089_p1)
}
  0x23   :  { %s2171_s3 = smov 128   ;;  %s2172_s28 = smov 8  }
  0x24   :  { %29 = dma.hbm_to_vmem [thread:$0]  %s2884_s0, 1024, %s24_s20, [#allocation6], %s2171_s3, %s2171_s3, %s2172_s28  }
  0x25   :  { %s2173_s10 = smov [#allocation10]   ;;  %s2093_s14 = scalar_lea.hbm %s2888_s4, 2048 }
  0x26   :  { %s51_s11 = sshll.u32 %s2173_s10, 4  ;;  %p2094_p2 = scmp.ne.s32.totalorder %s2888_s4, %s2093_s14  ;;  %s52_s11 = int_to_ptr.vmem [resolvable:$true] %s51_s11 }
  0x27   :  { %p2097_p3 = scmp.lt.u32.totalorder %s2093_s14, %s2888_s4 }
  0x29   :  { %p2099_p4 = pnand %p2097_p3, %p2094_p2 }
  0x2b   :  { %2102 = shalt.err (!%p2099_p4)
}
  0x2c   :  { %s2103_s22 = scalar_lea.vmem %s52_s11, 2048  ;;  %p2108_p6 = scmp.lt.s32.totalorder %s52_s11, %s52_s11 }
  0x2d   :  { %p2104_p5 = scmp.ne.s32.totalorder %s52_s11, %s2103_s22  ;;  %p2109_p7 = scmp.lt.s32.totalorder %s2103_s22, %s2103_s22 }
  0x2f   :  { %p2110_p8 = por %p2109_p7, %p2108_p6 }
  0x31   :  { %p2111_p9 = pnand %p2110_p8, %p2104_p5 }
  0x33   :  { %2114 = shalt.err (!%p2111_p9)
}
  0x34   :  { %57 = dma.hbm_to_vmem [thread:$0]  %s2888_s4, 2048, %s52_s11, [#allocation9], %s2168_s15, %s2168_s15, %s2169_s16  }
  0x35   :  { %2159 = dma.done.wait [#allocation6], 1024  }
  0x36   :  { %2160 = vsyncadd [#allocation6], 4294966272 }
  0x37   :  { %2161 = dma.done.wait [#allocation9], 3072  }
  0x38   :  { %2162 = vsyncadd [#allocation9], 4294964224  ;;  %vm79_vm0 = vcmask 261120   ;;  %v71_v0 = vld [vmem:[#allocation5] sm:$0xff]  ;;  %v73_v1 = vld [vmem:[#allocation5 + $0x10] sm:$0xff]  ;;  %vm388_vm1 = vcmask 523264  }
  0x39   :  { %v72_v2 = vld [vmem:[#allocation5 + $0x8] sm:$0xff]  ;;  %v80_v3 = vsel %vm79_vm0, %v71_v0, 0.0  ;;  %v86_v4 = vsel %vm79_vm0, %v73_v1, 0.0  ;;  %v74_v5 = vld [vmem:[#allocation5 + $0x18] sm:$0xff]  ;;  %v75_v8 = vld [vmem:[#allocation5 + $0x20] sm:$0xff]  ;;  %s2175_s4 = smov 64  }
  0x3a   :  { %81 = vadd.xlane.f32.xlu0 %v80_v3  ;;  %87 = vadd.xlane.f32.xlu1 %v86_v4  ;;  %v83_v6 = vsel %vm79_vm0, %v72_v2, 0.0  ;;  %v89_v7 = vsel %vm79_vm0, %v74_v5, 0.0  ;;  %v76_v9 = vld [vmem:[#allocation5 + $0x28] sm:$0xff]  ;;  %v92_v10 = vsel %vm79_vm0, %v75_v8, 0.0  ;;  %v77_v12 = vld [vmem:[#allocation5 + $0x30] sm:$0xff]  ;;  %v78_v13 = vld [vmem:[#allocation5 + $0x38] sm:$0xff] }
  0x3b   :  { %v95_v11 = vsel %vm79_vm0, %v76_v9, 0.0  ;;  %v98_v14 = vsel %vm79_vm0, %v77_v12, 0.0  ;;  %v101_v15 = vsel %vm79_vm0, %v78_v13, 0.0  ;;  %v216_v56 = vld [vmem:[#allocation8 + $0x8] sm:$0xff]  ;;  %v218_v57 = vld [vmem:[#allocation8 + $0x18] sm:$0xff]  ;;  %v215_v59 = vld [vmem:[#allocation8] sm:$0xff] }
  0x3c   :  { %v1780_v58 = vpack.c.bf16 %v218_v57, %v216_v56  ;;  %v217_v60 = vld [vmem:[#allocation8 + $0x10] sm:$0xff]  ;;  %v220_v62 = vld [vmem:[#allocation8 + $0x28] sm:$0xff]  ;;  %v222_v63 = vld [vmem:[#allocation8 + $0x38] sm:$0xff]  ;;  %v2174_v4 = vmov 0.0   ;;  %s2185_s27 = smov [#allocation11]  }
  0x3d   :  { %v1782_v61 = vpack.c.bf16 %v217_v60, %v215_v59  ;;  %323 = vmatprep.mubr.f32.mxu0 %v2174_v4  ;;  %513 = vmatprep.mubr.f32.mxu1 %v2174_v4  ;;  %389 = vst.msk [vmem:[#allocation3] sm:$0xff] %vm388_vm1, %v2174_v4  ;;  %390 = vst.msk [vmem:[#allocation4] sm:$0xff] %vm388_vm1, %v2174_v4  ;;  %v1746_v60 = vld [vmem:[%s2885_s1] ss:$0 sm:$0xff]  ;;  %s1719_s29 = sshll.u32 %s2185_s27, 4  ;;  %s2848_s29 = int_to_ptr.vmem [resolvable:$true] %s1719_s29 }
  0x3e   :  { %84 = vadd.xlane.f32.xlu0 %v83_v6  ;;  %90 = vadd.xlane.f32.xlu1 %v89_v7  ;;  %v433_v6 = vld [vmem:[#allocation10 + $0x18] sm:$0xff] }
  0x3f   :  { %1781 = vmatprep.subr.bf16.mxu0 %v1780_v58 }
  0x40   :  { %1783 = vmatpush1.bf16.msra.mxu0 %v1782_v61 }
  0x42   :  { %93 = vadd.xlane.f32.xlu0 %v92_v10  ;;  %96 = vadd.xlane.f32.xlu1 %v95_v11  ;;  %v435_v11 = vld [vmem:[#allocation10 + $0x28] sm:$0xff] }
  0x46   :  { %99 = vadd.xlane.f32.xlu0 %v98_v14  ;;  %102 = vadd.xlane.f32.xlu1 %v101_v15  ;;  %v434_v14 = vld [vmem:[#allocation10 + $0x20] sm:$0xff]  ;;  %v436_v15 = vld [vmem:[#allocation10 + $0x30] sm:$0xff] }
  0xc7   :  { %v82_v16 = vpop.xlane.xlu0 %81  ;;  %v88_v17 = vpop.xlane.xlu1 %87 }
  0xc8   :  { %v105_v18 = vmul.f32 0.03125, %v82_v16  ;;  %v107_v19 = vmul.f32 0.03125, %v88_v17  ;;  %v2335_v16 = vpack.c.bf16 %v436_v15, %v434_v14  ;;  %v439_v17 = vld [vmem:[#allocation10 + $0x48] sm:$0xff] }
  0xca   :  { %v2284_v20 = vsub.f32 %v71_v0, %v105_v18  ;;  %v2286_v21 = vsub.f32 %v73_v1, %v107_v19  ;;  %v1784_v0 = vpack.c.bf16 %v222_v63, %v220_v62  ;;  %v219_v1 = vld [vmem:[#allocation8 + $0x20] sm:$0xff]  ;;  %v441_v18 = vld [vmem:[#allocation10 + $0x58] sm:$0xff]  ;;  %v1747_v63 = vld [vmem:[%s2886_s2] ss:$0 sm:$0xff] }
  0xcb   :  { %v85_v22 = vpop.xlane.xlu0 %84  ;;  %v91_v23 = vpop.xlane.xlu1 %90  ;;  %v2339_v19 = vpack.c.bf16 %v441_v18, %v439_v17 }
  0xcc   :  { %v106_v24 = vmul.f32 0.03125, %v85_v22  ;;  %v108_v25 = vmul.f32 0.03125, %v91_v23  ;;  %v121_v26 = vmul.f32 %v2284_v20, %v2284_v20  ;;  %v123_v27 = vmul.f32 %v2286_v21, %v2286_v21  ;;  %1785 = vmatprep.subr.bf16.mxu0 %v1784_v0  ;;  %v438_v22 = vld [vmem:[#allocation10 + $0x40] sm:$0xff]  ;;  %v440_v23 = vld [vmem:[#allocation10 + $0x50] sm:$0xff] }
  0xce   :  { %v2292_v28 = vsub.f32 %v72_v2, %v106_v24  ;;  %v2294_v29 = vsub.f32 %v74_v5, %v108_v25  ;;  %v129_v30 = vsel %vm79_vm0, %v121_v26, 0.0  ;;  %v135_v33 = vsel %vm79_vm0, %v123_v27, 0.0  ;;  %v221_v2 = vld [vmem:[#allocation8 + $0x30] sm:$0xff]  ;;  %v431_v5 = vld [vmem:[#allocation10 + $0x8] sm:$0xff]  ;;  %v445_v26 = vld [vmem:[#allocation10 + $0x78] sm:$0xff] }
  0xcf   :  { %130 = vadd.xlane.f32.xlu0 %v129_v30  ;;  %v94_v31 = vpop.xlane.xlu0 %93  ;;  %v97_v32 = vpop.xlane.xlu1 %96  ;;  %v1786_v3 = vpack.c.bf16 %v221_v2, %v219_v1  ;;  %v2326_v7 = vpack.c.bf16 %v433_v6, %v431_v5  ;;  %v2341_v24 = vpack.c.bf16 %v440_v23, %v438_v22  ;;  %v443_v25 = vld [vmem:[#allocation10 + $0x68] sm:$0xff]  ;;  %v442_v30 = vld [vmem:[#allocation10 + $0x60] sm:$0xff] }
  0xd0   :  { %v109_v34 = vmul.f32 0.03125, %v94_v31  ;;  %v110_v35 = vmul.f32 0.03125, %v97_v32  ;;  %v122_v36 = vmul.f32 %v2292_v28, %v2292_v28  ;;  %v124_v37 = vmul.f32 %v2294_v29, %v2294_v29  ;;  %v444_v31 = vld [vmem:[#allocation10 + $0x70] sm:$0xff] }
  0xd1   :  { %1787 = vmatpush1.bf16.msra.mxu0 %v1786_v3  ;;  %1789 = vmatprep.subr.bf16.mxu1 %v2326_v7  ;;  %v2349_v27 = vpack.c.bf16 %v445_v26, %v443_v25  ;;  %v2351_v32 = vpack.c.bf16 %v444_v31, %v442_v30 }
  0xd2   :  { %v2302_v38 = vsub.f32 %v75_v8, %v109_v34  ;;  %v2304_v39 = vsub.f32 %v76_v9, %v110_v35  ;;  %v132_v40 = vsel %vm79_vm0, %v122_v36, 0.0  ;;  %v138_v43 = vsel %vm79_vm0, %v124_v37, 0.0  ;;  %v430_v8 = vld [vmem:[#allocation10] sm:$0xff]  ;;  %v432_v9 = vld [vmem:[#allocation10 + $0x10] sm:$0xff]  ;;  %1821 = vmatprep.subr.bf16.mxu0 %v2326_v7  ;;  %v2358_v34 = vld [vmem:[#allocation4] sm:$0xff] }
  0xd3   :  { %136 = vadd.xlane.f32.xlu0 %v135_v33  ;;  %133 = vadd.xlane.f32.xlu1 %v132_v40  ;;  %v100_v41 = vpop.xlane.xlu0 %99  ;;  %v103_v42 = vpop.xlane.xlu1 %102  ;;  %v2328_v10 = vpack.c.bf16 %v432_v9, %v430_v8  ;;  %v2356_v33 = vld [vmem:[#allocation3] sm:$0xff] }
  0xd4   :  { %v111_v44 = vmul.f32 0.03125, %v100_v41  ;;  %v112_v45 = vmul.f32 0.03125, %v103_v42  ;;  %v125_v46 = vmul.f32 %v2302_v38, %v2302_v38  ;;  %v126_v47 = vmul.f32 %v2304_v39, %v2304_v39 }
  0xd5   :  { %1791 = vmatpush1.bf16.msra.mxu1 %v2328_v10 }
  0xd6   :  { %v2312_v48 = vsub.f32 %v77_v12, %v111_v44  ;;  %v2314_v49 = vsub.f32 %v78_v13, %v112_v45  ;;  %v141_v50 = vsel %vm79_vm0, %v125_v46, 0.0  ;;  %v144_v51 = vsel %vm79_vm0, %v126_v47, 0.0  ;;  %v437_v12 = vld [vmem:[#allocation10 + $0x38] sm:$0xff] }
  0xd7   :  { %139 = vadd.xlane.f32.xlu1 %v138_v43  ;;  %142 = vadd.xlane.f32.xlu0 %v141_v50  ;;  %v2333_v13 = vpack.c.bf16 %v437_v12, %v435_v11 }
  0xd8   :  { %v127_v52 = vmul.f32 %v2312_v48, %v2312_v48  ;;  %v128_v53 = vmul.f32 %v2314_v49, %v2314_v49 }
  0xd9   :  { %1793 = vmatprep.subr.bf16.mxu1 %v2333_v13 }
  0xda   :  { %v147_v54 = vsel %vm79_vm0, %v127_v52, 0.0  ;;  %v150_v55 = vsel %vm79_vm0, %v128_v53, 0.0  ;;  %1795 = vmatpush1.bf16.msra.mxu1 %v2335_v16 }
  0xdb   :  { %145 = vadd.xlane.f32.xlu1 %v144_v51  ;;  %148 = vadd.xlane.f32.xlu0 %v147_v54 }
  0xdc   :  { %1797 = vmatprep.subr.bf16.mxu1 %v2339_v19 }
  0xde   :  { %1799 = vmatpush1.bf16.msra.mxu1 %v2341_v24 }
  0xdf   :  { %151 = vadd.xlane.f32.xlu1 %v150_v55  ;;  %1801 = vmatprep.subr.bf16.mxu1 %v2349_v27 }
  0xe2   :  { %1803 = vmatpush1.bf16.msra.mxu1 %v2351_v32 }
  0xe3   :  { %1805 = vmatprep.subr.bf16.mxu1 %v2326_v7 }
  0xe5   :  { %1756 = vmatmul.mubr.msk.f32.vlgmr.msra.gmra.mrb[0].mxu1 %vm388_vm1, %v2356_v33 }
  0xe6   :  { %1807 = vmatpush1.bf16.msra.mxu1 %v2328_v10  ;;  %685 = vmatprep.mubr.f32.mxu1 %v2174_v4 }
  0xe7   :  { %1809 = vmatprep.subr.bf16.mxu1 %v2333_v13 }
  0xea   :  { %1811 = vmatpush1.bf16.msra.mxu1 %v2335_v16 }
  0xeb   :  { %1813 = vmatprep.subr.bf16.mxu1 %v2339_v19 }
  0xee   :  { %1815 = vmatpush1.bf16.msra.mxu1 %v2341_v24 }
  0xef   :  { %1817 = vmatprep.subr.bf16.mxu1 %v2349_v27 }
  0xf1   :  { %537 = vrot.lane.b32.xlu0 %v2358_v34, %s2175_s4 }
  0xf2   :  { %1819 = vmatpush1.bf16.msra.mxu1 %v2351_v32 }
  0xf3   :  { %1837 = vmatprep.subr.bf16.mxu1 %v2326_v7 }
 0x15c   :  { %v131_v35 = vpop.xlane.xlu0 %130 }
 0x15d   :  { %v153_v36 = vmul.f32 0.03125, %v131_v35 }
 0x15f   :  { %v161_v37 = vadd.f32 1e-05, %v153_v36 }
 0x160   :  { %v134_v40 = vpop.xlane.xlu1 %133  ;;  %v137_v41 = vpop.xlane.xlu0 %136 }
 0x161   :  { %1937 = vrsqrt.f32 %v161_v37  ;;  %v154_v42 = vmul.f32 0.03125, %v134_v40  ;;  %v155_v43 = vmul.f32 0.03125, %v137_v41 }
 0x163   :  { %v162_v44 = vadd.f32 1e-05, %v154_v42  ;;  %v163_v45 = vadd.f32 1e-05, %v155_v43 }
 0x164   :  { %v140_v46 = vpop.xlane.xlu1 %139  ;;  %v143_v47 = vpop.xlane.xlu0 %142 }
 0x165   :  { %1939 = vrsqrt.f32 %v162_v44  ;;  %v156_v50 = vmul.f32 0.03125, %v140_v46  ;;  %v157_v51 = vmul.f32 0.03125, %v143_v47 }
 0x166   :  { %1941 = vrsqrt.f32 %v163_v45  ;;  %v225_v45 = vlaneseq }
 0x167   :  { %v164_v52 = vadd.f32 1e-05, %v156_v50  ;;  %v165_v53 = vadd.f32 1e-05, %v157_v51  ;;  %v223_v50 = vld [vmem:[%s2889_s5] sm:$0x3] }
 0x168   :  { %v146_v54 = vpop.xlane.xlu1 %145  ;;  %v149_v55 = vpop.xlane.xlu0 %148  ;;  %v226_v46 = vshrl.u32 %v225_v45, 7 }
 0x169   :  { %1943 = vrsqrt.f32 %v164_v52  ;;  %v158_v56 = vmul.f32 0.03125, %v146_v54  ;;  %v159_v59 = vmul.f32 0.03125, %v149_v55 }
 0x16a   :  { %1945 = vrsqrt.f32 %v165_v53  ;;  %v227_v47 = vsub.s32 0, %v226_v46  ;;  %v231_v52 = vsub.s32 1, %v226_v46 }
 0x16b   :  { %v1938_v57 = vpop.eup %1937  ;;  %v166_v58 = vadd.f32 1e-05, %v158_v56  ;;  %v167_v2 = vadd.f32 1e-05, %v159_v59  ;;  %v2422_v59 = vand.u32 127, %v225_v45 }
 0x16c   :  { %v152_v61 = vpop.xlane.xlu1 %151  ;;  %v177_v62 = vmul.f32 %v1938_v57, %v2284_v20  ;;  %v228_v54 = vrot.slane %v223_v50, %v227_v47  ;;  %v232_v55 = vrot.slane %v223_v50, %v231_v52 }
 0x16d   :  { %1947 = vrsqrt.f32 %v166_v58  ;;  %v160_v3 = vmul.f32 0.03125, %v152_v61  ;;  %vm421_vm4 = vcmp.lt.s32.totalorder %v2422_v59, 32 }
 0x16e   :  { %v192_v0 = vmul.f32 %v1746_v60, %v177_v62  ;;  %1949 = vrsqrt.f32 %v167_v2 }
 0x16f   :  { %v1940_v1 = vpop.eup %1939  ;;  %v168_v20 = vadd.f32 1e-05, %v160_v3  ;;  %v399_v3 = vand.u32 63, %v2422_v59 }
 0x170   :  { %v1942_v5 = vpop.eup %1941  ;;  %v207_v6 = vadd.f32 %v1747_v63, %v192_v0  ;;  %v178_v8 = vmul.f32 %v1940_v1, %v2292_v28  ;;  %v394_v0 = vadd.s32 128, %v2422_v59 }
 0x171   :  { %v179_v9 = vmul.f32 %v1942_v5, %v2286_v21  ;;  %1951 = vrsqrt.f32 %v168_v20  ;;  %vm2436_vm2 = vcmp.lt.s32.totalorder %v399_v3, 32 }
 0x172   :  { %1748 = vmatmul.mubr.msk.f32.vlgmr.msra.gmra.mrb[0].mxu0 %vm79_vm0, %v207_v6  ;;  %v193_v11 = vmul.f32 %v1746_v60, %v178_v8  ;;  %v406_v8 = vand.u32 63, %v394_v0 }
 0x173   :  { %v1944_v12 = vpop.eup %1943  ;;  %329 = vmatprep.mubr.f32.mxu0 %v2174_v4  ;;  %1823 = vmatpush1.bf16.msra.mxu0 %v2328_v10  ;;  %v194_v15 = vmul.f32 %v1746_v60, %v179_v9 }
 0x174   :  { %v208_v14 = vadd.f32 %v1747_v63, %v193_v11  ;;  %v180_v17 = vmul.f32 %v1944_v12, %v2294_v29  ;;  %1825 = vmatprep.subr.bf16.mxu0 %v2333_v13  ;;  %v1946_v18 = vpop.eup %1945  ;;  %vm2442_vm3 = vcmp.lt.s32.totalorder %v406_v8, 32 }
 0x175   :  { %v209_v21 = vadd.f32 %v1747_v63, %v194_v15  ;;  %v181_v22 = vmul.f32 %v1946_v18, %v2302_v38 }
 0x176   :  { %1749 = vmatmul.mubr.msk.f32.gmra.mrb[2].mxu0 %vm79_vm0, %v208_v14  ;;  %v195_v28 = vmul.f32 %v1746_v60, %v180_v17 }
 0x177   :  { %335 = vmatprep.mubr.f32.mxu0 %v2174_v4  ;;  %1827 = vmatpush1.bf16.msra.mxu0 %v2335_v16  ;;  %v1948_v23 = vpop.eup %1947  ;;  %v196_v25 = vmul.f32 %v1746_v60, %v181_v22 }
 0x178   :  { %1829 = vmatprep.subr.bf16.mxu0 %v2339_v19  ;;  %v210_v29 = vadd.f32 %v1747_v63, %v195_v28  ;;  %v182_v26 = vmul.f32 %v1948_v23, %v2304_v39  ;;  %v1950_v30 = vpop.eup %1949 }
 0x179   :  { %v211_v38 = vadd.f32 %v1747_v63, %v196_v25  ;;  %v183_v35 = vmul.f32 %v1950_v30, %v2312_v48 }
 0x17a   :  { %1750 = vmatmul.mubr.msk.f32.gmra.mrb[4].mxu0 %vm79_vm0, %v209_v21  ;;  %v197_v31 = vmul.f32 %v1746_v60, %v182_v26 }
 0x17b   :  { %341 = vmatprep.mubr.f32.mxu0 %v2174_v4  ;;  %1831 = vmatpush1.bf16.msra.mxu0 %v2341_v24  ;;  %v1952_v36 = vpop.eup %1951  ;;  %v198_v37 = vmul.f32 %v1746_v60, %v183_v35 }
 0x17c   :  { %1833 = vmatprep.subr.bf16.mxu0 %v2349_v27  ;;  %v212_v39 = vadd.f32 %v1747_v63, %v197_v31  ;;  %v184_v40 = vmul.f32 %v1952_v36, %v2314_v49  ;;  %v2176_v49 = vmov 0  }
 0x17d   :  { %v213_v41 = vadd.f32 %v1747_v63, %v198_v37  ;;  %1935 = vset.pattern.permute.xlu1 %v2176_v49  ;;  %1936 = vset.pattern.permute.xlu0 %v2176_v49 }
 0x17e   :  { %1751 = vmatmul.mubr.msk.f32.gmra.mrb[6].mxu0 %vm79_vm0, %v210_v29  ;;  %v199_v42 = vmul.f32 %v1746_v60, %v184_v40 }
 0x17f   :  { %347 = vmatprep.mubr.f32.mxu0 %v2174_v4  ;;  %1835 = vmatpush1.bf16.msra.mxu0 %v2351_v32 }
 0x180   :  { %1853 = vmatprep.subr.bf16.mxu0 %v2326_v7  ;;  %v214_v48 = vadd.f32 %v1747_v63, %v199_v42 }
 0x182   :  { %1752 = vmatmul.mubr.msk.f32.gmra.mrb[8].mxu0 %vm79_vm0, %v211_v38 }
 0x183   :  { %353 = vmatprep.mubr.f32.mxu0 %v2174_v4 }
 0x186   :  { %1753 = vmatmul.mubr.msk.f32.gmra.mrb[10].mxu0 %vm79_vm0, %v212_v39 }
 0x187   :  { %359 = vmatprep.mubr.f32.mxu0 %v2174_v4 }
 0x18a   :  { %1754 = vmatmul.mubr.msk.f32.gmra.mrb[12].mxu0 %vm79_vm0, %v213_v41 }
 0x18b   :  { %365 = vmatprep.mubr.f32.mxu0 %v2174_v4 }
 0x18e   :  { %1755 = vmatmul.mubr.msk.f32.gmra.mrb[14].mxu0 %vm79_vm0, %v214_v48 }
 0x18f   :  { %854 = vmatprep.mubr.f32.mxu0 %v2174_v4 }
 0x1b8   :  { %v2411_v43 = vpop.f32.mrb[0].mxu1 }
 0x1b9   :  { %v2413_v44 = vpop.f32.mrb[1].mxu1 }
 0x245   :  { %v325_v51 = vpop.f32.mrb[0].mxu0 }
 0x246   :  { %v327_v53 = vpop.f32.mrb[1].mxu0  ;;  %v2504_v47 = vadd.f32 %v325_v51, %v228_v54 }
 0x249   :  { %v331_v56 = vpop.f32.mrb[2].mxu0 }
 0x24a   :  { %v2420_v57 = vadd.f32 %v331_v56, %v228_v54  ;;  %v333_v58 = vpop.f32.mrb[3].mxu0  ;;  %v2508_v56 = vadd.f32 %v327_v53, %v232_v55 }
 0x24b   :  { %v2424_v60 = vadd.f32 %v333_v58, %v232_v55 }
 0x24d   :  { %v337_v61 = vpop.f32.mrb[4].mxu0 }
 0x24e   :  { %v2426_v62 = vadd.f32 %v337_v61, %v228_v54  ;;  %v339_v63 = vpop.f32.mrb[5].mxu0 }
 0x24f   :  { %v2429_v1 = vadd.f32 %v339_v63, %v232_v55 }
 0x251   :  { %v343_v2 = vpop.f32.mrb[6].mxu0 }
 0x252   :  { %v2432_v5 = vadd.f32 %v343_v2, %v228_v54  ;;  %v345_v6 = vpop.f32.mrb[7].mxu0 }
 0x253   :  { %v2434_v9 = vadd.f32 %v345_v6, %v232_v55 }
 0x255   :  { %v349_v11 = vpop.f32.mrb[8].mxu0 }
 0x256   :  { %v2440_v20 = vadd.f32 %v349_v11, %v228_v54  ;;  %v351_v14 = vpop.f32.mrb[9].mxu0  ;;  %v2534_v11 = vld [vmem:[%s2890_s6] sm:$0xff]  ;;  %s2184_s6 = smov [#allocation12]  }
 0x257   :  { %v2446_v17 = vadd.f32 %v351_v14, %v232_v55  ;;  %vm549_vm12 = vcmp.gt.s32.totalorder %v2534_v11, 0  ;;  %vm721_vm13 = vcmp.gt.s32.totalorder %v2534_v11, 1  ;;  %vm722_vm14 = vcmp.gt.s32.totalorder %v2534_v11, 6  ;;  %s1732_s26 = sshll.u32 %s2184_s6, 4  ;;  %s1733_s26 = int_to_ptr.vmem [resolvable:$true] %s1732_s26 }
 0x258   :  { %v937_v18 = vsel %vm2436_vm2, %v2432_v5, %v2440_v20  ;;  %v1104_v21 = vsel %vm2436_vm2, %v2440_v20, %v2432_v5  ;;  %vm891_vm15 = vcmp.gt.s32.totalorder %v2534_v11, 5  ;;  %s2115_s30 = scalar_lea.vmem %s1733_s26, 128  ;;  %p2120_p11 = scmp.lt.s32.totalorder %s1733_s26, %s1733_s26 }
 0x259   :  { %v355_v28 = vpop.f32.mrb[10].mxu0  ;;  %v938_v22 = vsel %vm2442_vm3, %v2434_v9, %v2446_v17  ;;  %v1105_v23 = vsel %vm2442_vm3, %v2446_v17, %v2434_v9  ;;  %p2116_p10 = scmp.ne.s32.totalorder %s1733_s26, %s2115_s30  ;;  %p2121_p12 = scmp.lt.s32.totalorder %s2115_s30, %s2115_s30 }
 0x25a   :  { %v2464_v29 = vadd.f32 %v355_v28, %v228_v54  ;;  %v357_v25 = vpop.f32.mrb[11].mxu0  ;;  %v538_v28 = vpop.permute.xlu0 %537 }
 0x25b   :  { %v2466_v26 = vadd.f32 %v357_v25, %v232_v55  ;;  %p2122_p13 = por %p2121_p12, %p2120_p11 }
 0x25c   :  { %v768_v30 = vsel %vm2436_vm2, %v2426_v62, %v2464_v29  ;;  %v1257_v38 = vsel %vm2436_vm2, %v2464_v29, %v2426_v62 }
 0x25d   :  { %v361_v31 = vpop.f32.mrb[12].mxu0  ;;  %v769_v35 = vsel %vm2442_vm3, %v2429_v1, %v2466_v26  ;;  %v1258_v36 = vsel %vm2442_vm3, %v2466_v26, %v2429_v1  ;;  %p2123_p0 = pnand %p2122_p13, %p2116_p10 }
 0x25e   :  { %v2484_v39 = vadd.f32 %v361_v31, %v228_v54  ;;  %v363_v37 = vpop.f32.mrb[13].mxu0 }
 0x25f   :  { %v2486_v40 = vadd.f32 %v363_v37, %v232_v55 }
 0x260   :  { %v599_v41 = vsel %vm2436_vm2, %v2420_v57, %v2484_v39  ;;  %v1410_v42 = vsel %vm2436_vm2, %v2484_v39, %v2420_v57  ;;  %v1567_v39 = vld [vmem:[#allocation10 + $0x8] sm:$0xff] }
 0x261   :  { %v367_v48 = vpop.f32.mrb[14].mxu0  ;;  %v600_v45 = vsel %vm2442_vm3, %v2424_v60, %v2486_v40  ;;  %v1411_v46 = vsel %vm2442_vm3, %v2486_v40, %v2424_v60 }
 0x262   :  { %v2506_v50 = vadd.f32 %v367_v48, %v228_v54  ;;  %v369_v52 = vpop.f32.mrb[15].mxu0 }
 0x263   :  { %v2510_v58 = vadd.f32 %v369_v52, %v232_v55 }
 0x264   :  { %v427_v61 = vsel %vm2436_vm2, %v2504_v47, %v2506_v50  ;;  %v1563_v63 = vsel %vm2436_vm2, %v2506_v50, %v2504_v47  ;;  %vm550_vm2 = vcmp.gt.s32.totalorder %v2534_v11, 7 }
 0x265   :  { %v520_v51 = vadd.f32 %v2411_v43, %v427_v61  ;;  %v428_v53 = vsel %vm2442_vm3, %v2508_v56, %v2510_v58  ;;  %v1564_v54 = vsel %vm2442_vm3, %v2510_v58, %v2508_v56  ;;  %v580_v58 = vsel %vm550_vm2, 1, %v2176_v49 }
 0x266   :  { %v521_v55 = vadd.f32 %v2413_v44, %v428_v53  ;;  %vm890_vm3 = vcmp.gt.s32.totalorder %v2534_v11, 2 }
 0x267   :  { %v1757_v0 = vmul.f32 -1.442695, %v520_v51 }
 0x268   :  { %v1758_v14 = vmul.f32 -1.442695, %v521_v55 }
 0x269   :  { %1953 = vpow2.f32 %v1757_v0 }
 0x26a   :  { %1955 = vtanh.f32 %v521_v55  ;;  %v2177_v55 = vmov 7  }
 0x26b   :  { %v551_v0 = vsel %vm421_vm4, 0, %v2177_v55 }
 0x273   :  { %v1954_v2 = vpop.eup %1953 }
 0x274   :  { %v525_v3 = vadd.f32 1.0, %v1954_v2  ;;  %v1956_v6 = vpop.eup %1955 }
 0x276   :  { %1957 = vrcp.f32 %v525_v3 }
 0x277   :  { %1959 = vpow2.f32 %v1758_v14 }
 0x280   :  { %v1958_v43 = vpop.eup %1957 }
 0x281   :  { %v541_v8 = vmul.f32 %v1958_v43, %v1956_v6  ;;  %v1960_v44 = vpop.eup %1959  ;;  %v540_v31 = vmul.f32 %v1958_v43, %v538_v28 }
 0x282   :  { %v532_v25 = vadd.f32 1.0, %v1960_v44 }
 0x283   :  { %543 = vrot.lane.b32.xlu1 %v541_v8, %s2175_s4 }
 0x284   :  { %1961 = vrcp.f32 %v532_v25 }
 0x287   :  { %553 = vperm.xlu1 %1935, %v2534_v11  }
 0x28e   :  { %v1962_v52 = vpop.eup %1961 }
 0x2f5   :  { %v544_v37 = vpop.permute.xlu1 %543 }
 0x2f6   :  { %v546_v48 = vadd.f32 %v544_v37, %v540_v31 }
 0x2f8   :  { %1963 = vtanh.f32 %v546_v48  ;;  %557 = vrot.lane.b32.xlu0 %v546_v48, %s2175_s4 }
 0x302   :  { %v1964_v61 = vpop.eup %1963 }
 0x303   :  { %v2538_v51 = vmul.f32 %v1964_v61, %v1962_v52 }
 0x305   :  { %564 = vrot.lane.b32.xlu1 %v2538_v51, %s2175_s4 }
 0x306   :  { %v2543_v53 = vpop.permute.xlu1 %553 }
 0x307   :  { %vm555_vm5 = vcmp.lt.s32.totalorder %v551_v0, %v2543_v53 }
 0x36a   :  { %v558_v2 = vpop.permute.xlu0 %557 }
 0x36b   :  { %v560_v3 = vsel %vm555_vm5, %v558_v2, %v2358_v34 }
 0x36c   :  { %561 = vst.msk [vmem:[#allocation4] sm:$0xff] %vm388_vm1, %v560_v3 }
 0x373   :  { %v707_v6 = vld [vmem:[#allocation4] sm:$0xff] }
 0x374   :  { %709 = vrot.lane.b32.xlu1 %v707_v6, %s2175_s4 }
 0x377   :  { %v565_v43 = vpop.permute.xlu1 %564 }
 0x378   :  { %v567_v8 = vsel %vm555_vm5, %v565_v43, %v2356_v33  ;;  %vm1060_vm5 = vcmp.gt.s32.totalorder %v2534_v11, 4 }
 0x379   :  { %568 = vst.msk [vmem:[#allocation3] sm:$0xff] %vm388_vm1, %v567_v8 }
 0x380   :  { %v601_v14 = vld [vmem:[#allocation3] sm:$0xff] }
 0x381   :  { %1759 = vmatmul.mubr.msk.f32.vlgmr.msra.gmra.mrb[2].mxu1 %vm388_vm1, %v601_v14 }
 0x382   :  { %1839 = vmatpush1.bf16.msra.mxu1 %v2328_v10  ;;  %1023 = vmatprep.mubr.f32.mxu1 %v2174_v4 }
 0x383   :  { %1841 = vmatprep.subr.bf16.mxu1 %v2333_v13 }
 0x386   :  { %1843 = vmatpush1.bf16.msra.mxu1 %v2335_v16 }
 0x387   :  { %1845 = vmatprep.subr.bf16.mxu1 %v2339_v19 }
 0x38a   :  { %1847 = vmatpush1.bf16.msra.mxu1 %v2341_v24 }
 0x38b   :  { %1849 = vmatprep.subr.bf16.mxu1 %v2349_v27 }
 0x38e   :  { %1851 = vmatpush1.bf16.msra.mxu1 %v2351_v32 }
 0x38f   :  { %1869 = vmatprep.subr.bf16.mxu1 %v2326_v7 }
 0x3e6   :  { %v710_v0 = vpop.permute.xlu1 %709 }
 0x454   :  { %v687_v33 = vpop.f32.mrb[2].mxu1 }
 0x455   :  { %v692_v34 = vadd.f32 %v687_v33, %v599_v41  ;;  %v689_v44 = vpop.f32.mrb[3].mxu1 }
 0x456   :  { %v693_v28 = vadd.f32 %v689_v44, %v600_v45  ;;  %v2178_v44 = vmov 6  }
 0x457   :  { %v1760_v25 = vmul.f32 -1.442695, %v692_v34 }
 0x458   :  { %v1761_v55 = vmul.f32 -1.442695, %v693_v28 }
 0x459   :  { %1965 = vpow2.f32 %v1760_v25 }
 0x45a   :  { %1967 = vtanh.f32 %v693_v28  ;;  %v723_v28 = vsel %vm421_vm4, 1, %v2178_v44 }
 0x45b   :  { %vm724_vm6 = vcmp.lt.s32.totalorder %v723_v28, %v2543_v53 }
 0x463   :  { %v1966_v31 = vpop.eup %1965 }
 0x464   :  { %v697_v37 = vadd.f32 1.0, %v1966_v31  ;;  %v1968_v48 = vpop.eup %1967 }
 0x466   :  { %1969 = vrcp.f32 %v697_v37 }
 0x467   :  { %1971 = vpow2.f32 %v1761_v55 }
 0x470   :  { %v1970_v52 = vpop.eup %1969 }
 0x471   :  { %v713_v61 = vmul.f32 %v1970_v52, %v1968_v48  ;;  %v1972_v41 = vpop.eup %1971  ;;  %v712_v3 = vmul.f32 %v1970_v52, %v710_v0 }
 0x472   :  { %v704_v2 = vadd.f32 1.0, %v1972_v41 }
 0x473   :  { %715 = vrot.lane.b32.xlu0 %v713_v61, %s2175_s4 }
 0x474   :  { %1973 = vrcp.f32 %v704_v2 }
 0x47e   :  { %v1974_v45 = vpop.eup %1973 }
 0x4e5   :  { %v716_v43 = vpop.permute.xlu0 %715 }
 0x4e6   :  { %v718_v8 = vadd.f32 %v716_v43, %v712_v3 }
 0x4e8   :  { %1975 = vtanh.f32 %v718_v8  ;;  %726 = vrot.lane.b32.xlu0 %v718_v8, %s2175_s4 }
 0x4f2   :  { %v1976_v33 = vpop.eup %1975 }
 0x4f3   :  { %v2575_v34 = vmul.f32 %v1976_v33, %v1974_v45 }
 0x4f5   :  { %733 = vrot.lane.b32.xlu1 %v2575_v34, %s2175_s4 }
 0x55a   :  { %v727_v25 = vpop.permute.xlu0 %726 }
 0x55b   :  { %v729_v31 = vsel %vm724_vm6, %v727_v25, %v707_v6 }
 0x55c   :  { %730 = vst.msk [vmem:[#allocation4] sm:$0xff] %vm388_vm1, %v729_v31 }
 0x563   :  { %v876_v37 = vld [vmem:[#allocation4] sm:$0xff] }
 0x564   :  { %878 = vrot.lane.b32.xlu1 %v876_v37, %s2175_s4 }
 0x567   :  { %v734_v48 = vpop.permute.xlu1 %733 }
 0x568   :  { %v736_v52 = vsel %vm724_vm6, %v734_v48, %v601_v14 }
 0x569   :  { %737 = vst.msk [vmem:[#allocation3] sm:$0xff] %vm388_vm1, %v736_v52 }
 0x570   :  { %v770_v61 = vld [vmem:[#allocation3] sm:$0xff] }
 0x571   :  { %1762 = vmatmul.mubr.msk.f32.vlgmr.msra.gmra.mrb[16].mxu0 %vm388_vm1, %v770_v61 }
 0x572   :  { %1855 = vmatpush1.bf16.msra.mxu0 %v2328_v10  ;;  %1190 = vmatprep.mubr.f32.mxu0 %v2174_v4 }
 0x573   :  { %1857 = vmatprep.subr.bf16.mxu0 %v2333_v13 }
 0x576   :  { %1859 = vmatpush1.bf16.msra.mxu0 %v2335_v16 }
 0x577   :  { %1861 = vmatprep.subr.bf16.mxu0 %v2339_v19 }
 0x57a   :  { %1863 = vmatpush1.bf16.msra.mxu0 %v2341_v24 }
 0x57b   :  { %1865 = vmatprep.subr.bf16.mxu0 %v2349_v27 }
 0x57e   :  { %1867 = vmatpush1.bf16.msra.mxu0 %v2351_v32 }
 0x57f   :  { %1885 = vmatprep.subr.bf16.mxu0 %v2326_v7 }
 0x5d6   :  { %v879_v33 = vpop.permute.xlu1 %878 }
 0x644   :  { %v856_v6 = vpop.f32.mrb[16].mxu0 }
 0x645   :  { %v861_v14 = vadd.f32 %v856_v6, %v768_v30  ;;  %v858_v55 = vpop.f32.mrb[17].mxu0  ;;  %v2179_v6 = vmov 5  }
 0x646   :  { %v862_v41 = vadd.f32 %v858_v55, %v769_v35 }
 0x647   :  { %v1763_v0 = vmul.f32 -1.442695, %v861_v14  ;;  %v892_v14 = vsel %vm421_vm4, 2, %v2179_v6 }
 0x648   :  { %v1764_v45 = vmul.f32 -1.442695, %v862_v41  ;;  %vm893_vm7 = vcmp.lt.s32.totalorder %v892_v14, %v2543_v53 }
 0x649   :  { %1977 = vpow2.f32 %v1763_v0 }
 0x64a   :  { %1979 = vtanh.f32 %v862_v41 }
 0x653   :  { %v1978_v2 = vpop.eup %1977 }
 0x654   :  { %v866_v3 = vadd.f32 1.0, %v1978_v2  ;;  %v1980_v7 = vpop.eup %1979 }
 0x656   :  { %1981 = vrcp.f32 %v866_v3 }
 0x657   :  { %1983 = vpow2.f32 %v1764_v45 }
 0x660   :  { %v1982_v43 = vpop.eup %1981 }
 0x661   :  { %v882_v8 = vmul.f32 %v1982_v43, %v1980_v7  ;;  %v1984_v30 = vpop.eup %1983  ;;  %v881_v28 = vmul.f32 %v1982_v43, %v879_v33 }
 0x662   :  { %v873_v44 = vadd.f32 1.0, %v1984_v30 }
 0x663   :  { %884 = vrot.lane.b32.xlu0 %v882_v8, %s2175_s4 }
 0x664   :  { %1985 = vrcp.f32 %v873_v44 }
 0x66e   :  { %v1986_v35 = vpop.eup %1985 }
 0x6d5   :  { %v885_v25 = vpop.permute.xlu0 %884 }
 0x6d6   :  { %v887_v31 = vadd.f32 %v885_v25, %v881_v28 }
 0x6d8   :  { %1987 = vtanh.f32 %v887_v31  ;;  %895 = vrot.lane.b32.xlu0 %v887_v31, %s2175_s4 }
 0x6e2   :  { %v1988_v48 = vpop.eup %1987 }
 0x6e3   :  { %v2607_v52 = vmul.f32 %v1988_v48, %v1986_v35 }
 0x6e5   :  { %902 = vrot.lane.b32.xlu1 %v2607_v52, %s2175_s4 }
 0x74a   :  { %v896_v55 = vpop.permute.xlu0 %895 }
 0x74b   :  { %v898_v41 = vsel %vm893_vm7, %v896_v55, %v876_v37 }
 0x74c   :  { %899 = vst.msk [vmem:[#allocation4] sm:$0xff] %vm388_vm1, %v898_v41 }
 0x753   :  { %v1045_v0 = vld [vmem:[#allocation4] sm:$0xff] }
 0x754   :  { %1047 = vrot.lane.b32.xlu1 %v1045_v0, %s2175_s4 }
 0x757   :  { %v903_v2 = vpop.permute.xlu1 %902 }
 0x758   :  { %v905_v3 = vsel %vm893_vm7, %v903_v2, %v770_v61 }
 0x759   :  { %906 = vst.msk [vmem:[#allocation3] sm:$0xff] %vm388_vm1, %v905_v3  ;;  %v2180_v3 = vmov 4  }
 0x760   :  { %v939_v7 = vld [vmem:[#allocation3] sm:$0xff] }
 0x761   :  { %1765 = vmatmul.mubr.msk.f32.vlgmr.msra.gmra.mrb[4].mxu1 %vm388_vm1, %v939_v7 }
 0x762   :  { %1871 = vmatpush1.bf16.msra.mxu1 %v2328_v10  ;;  %1343 = vmatprep.mubr.f32.mxu1 %v2174_v4 }
 0x763   :  { %1873 = vmatprep.subr.bf16.mxu1 %v2333_v13 }
 0x766   :  { %1875 = vmatpush1.bf16.msra.mxu1 %v2335_v16 }
 0x767   :  { %1877 = vmatprep.subr.bf16.mxu1 %v2339_v19 }
 0x76a   :  { %1879 = vmatpush1.bf16.msra.mxu1 %v2341_v24 }
 0x76b   :  { %1881 = vmatprep.subr.bf16.mxu1 %v2349_v27 }
 0x76e   :  { %1883 = vmatpush1.bf16.msra.mxu1 %v2351_v32 }
 0x7c6   :  { %v1048_v35 = vpop.permute.xlu1 %1047 }
 0x834   :  { %v1025_v37 = vpop.f32.mrb[4].mxu1 }
 0x835   :  { %v1030_v61 = vadd.f32 %v1025_v37, %v937_v18  ;;  %v1027_v43 = vpop.f32.mrb[5].mxu1  ;;  %v1061_v37 = vsel %vm421_vm4, 3, %v2180_v3 }
 0x836   :  { %v1031_v8 = vadd.f32 %v1027_v43, %v938_v22  ;;  %vm1062_vm8 = vcmp.lt.s32.totalorder %v1061_v37, %v2543_v53 }
 0x837   :  { %v1766_v45 = vmul.f32 -1.442695, %v1030_v61 }
 0x838   :  { %v1767_v31 = vmul.f32 -1.442695, %v1031_v8 }
 0x839   :  { %1989 = vpow2.f32 %v1766_v45 }
 0x83a   :  { %1991 = vtanh.f32 %v1031_v8 }
 0x843   :  { %v1990_v30 = vpop.eup %1989 }
 0x844   :  { %v1035_v33 = vadd.f32 1.0, %v1990_v30  ;;  %v1992_v44 = vpop.eup %1991 }
 0x846   :  { %1993 = vrcp.f32 %v1035_v33 }
 0x847   :  { %1995 = vpow2.f32 %v1767_v31 }
 0x850   :  { %v1994_v28 = vpop.eup %1993 }
 0x851   :  { %v1051_v25 = vmul.f32 %v1994_v28, %v1992_v44  ;;  %v1996_v18 = vpop.eup %1995  ;;  %v1050_v6 = vmul.f32 %v1994_v28, %v1048_v35  ;;  %v2181_v35 = vmov 3  }
 0x852   :  { %v1042_v48 = vadd.f32 1.0, %v1996_v18 }
 0x853   :  { %1053 = vrot.lane.b32.xlu0 %v1051_v25, %s2175_s4 }
 0x854   :  { %1997 = vrcp.f32 %v1042_v48  ;;  %v1226_v48 = vsel %vm421_vm4, 4, %v2181_v35 }
 0x855   :  { %vm1227_vm9 = vcmp.lt.s32.totalorder %v1226_v48, %v2543_v53 }
 0x85e   :  { %v1998_v22 = vpop.eup %1997 }
 0x8c5   :  { %v1054_v14 = vpop.permute.xlu0 %1053 }
 0x8c6   :  { %v1056_v55 = vadd.f32 %v1054_v14, %v1050_v6 }
 0x8c8   :  { %1999 = vtanh.f32 %v1056_v55  ;;  %1064 = vrot.lane.b32.xlu0 %v1056_v55, %s2175_s4 }
 0x8d2   :  { %v2000_v41 = vpop.eup %1999 }
 0x8d3   :  { %v2638_v2 = vmul.f32 %v2000_v41, %v1998_v22 }
 0x8d5   :  { %1071 = vrot.lane.b32.xlu1 %v2638_v2, %s2175_s4 }
 0x93a   :  { %v1065_v61 = vpop.permute.xlu0 %1064 }
 0x93b   :  { %v1067_v43 = vsel %vm1062_vm8, %v1065_v61, %v1045_v0 }
 0x93c   :  { %1068 = vst.msk [vmem:[#allocation4] sm:$0xff] %vm388_vm1, %v1067_v43 }
 0x943   :  { %v1212_v8 = vld [vmem:[#allocation4] sm:$0xff] }
 0x944   :  { %1214 = vrot.lane.b32.xlu1 %v1212_v8, %s2175_s4 }
 0x947   :  { %v1072_v45 = vpop.permute.xlu1 %1071 }
 0x948   :  { %v1074_v30 = vsel %vm1062_vm8, %v1072_v45, %v939_v7  ;;  %vm1059_vm8 = vcmp.gt.s32.totalorder %v2534_v11, 3 }
 0x949   :  { %1075 = vst.msk [vmem:[#allocation3] sm:$0xff] %vm388_vm1, %v1074_v30 }
 0x950   :  { %v1106_v33 = vld [vmem:[#allocation3] sm:$0xff] }
 0x951   :  { %1768 = vmatmul.mubr.msk.f32.vlgmr.msra.gmra.mrb[18].mxu0 %vm388_vm1, %v1106_v33 }
 0x952   :  { %1887 = vmatpush1.bf16.msra.mxu0 %v2328_v10  ;;  %1496 = vmatprep.mubr.f32.mxu0 %v2174_v4 }
 0x953   :  { %1889 = vmatprep.subr.bf16.mxu0 %v2333_v13 }
 0x956   :  { %1891 = vmatpush1.bf16.msra.mxu0 %v2335_v16 }
 0x957   :  { %1893 = vmatprep.subr.bf16.mxu0 %v2339_v19 }
 0x95a   :  { %1895 = vmatpush1.bf16.msra.mxu0 %v2341_v24 }
 0x95b   :  { %1897 = vmatprep.subr.bf16.mxu0 %v2349_v27 }
 0x95e   :  { %1899 = vmatpush1.bf16.msra.mxu0 %v2351_v32 }
 0xa24   :  { %v1192_v0 = vpop.f32.mrb[18].mxu0 }
 0xa25   :  { %v1197_v10 = vadd.f32 %v1192_v0, %v1104_v21  ;;  %v1194_v7 = vpop.f32.mrb[19].mxu0  ;;  %v1215_v21 = vpop.permute.xlu1 %1214 }
 0xa26   :  { %v1198_v13 = vadd.f32 %v1194_v7, %v1105_v23 }
 0xa27   :  { %v1769_v16 = vmul.f32 -1.442695, %v1197_v10 }
 0xa28   :  { %v1770_v5 = vmul.f32 -1.442695, %v1198_v13 }
 0xa29   :  { %2001 = vpow2.f32 %v1769_v16 }
 0xa2a   :  { %2003 = vtanh.f32 %v1198_v13 }
 0xa33   :  { %v2002_v19 = vpop.eup %2001 }
 0xa34   :  { %v1202_v24 = vadd.f32 1.0, %v2002_v19  ;;  %v2004_v27 = vpop.eup %2003 }
 0xa36   :  { %2005 = vrcp.f32 %v1202_v24  ;;  %v2182_v24 = vmov 2  }
 0xa37   :  { %2007 = vpow2.f32 %v1770_v5 }
 0xa40   :  { %v2006_v32 = vpop.eup %2005 }
 0xa41   :  { %v1218_v44 = vmul.f32 %v2006_v32, %v2004_v27  ;;  %v2008_v20 = vpop.eup %2007  ;;  %v1217_v25 = vmul.f32 %v2006_v32, %v1215_v21  ;;  %v1379_v27 = vsel %vm421_vm4, 5, %v2182_v24  ;;  %v1578_v24 = vld [vmem:[#allocation10 + $0x60] sm:$0xff] }
 0xa42   :  { %v1209_v28 = vadd.f32 1.0, %v2008_v20  ;;  %vm1380_vm10 = vcmp.lt.s32.totalorder %v1379_v27, %v2543_v53  ;;  %v1580_v27 = vld [vmem:[#allocation10 + $0x70] sm:$0xff] }
 0xa43   :  { %1220 = vrot.lane.b32.xlu0 %v1218_v44, %s2175_s4 }
 0xa44   :  { %2009 = vrcp.f32 %v1209_v28 }
 0xa4e   :  { %v2010_v17 = vpop.eup %2009 }
 0xab5   :  { %v1221_v31 = vpop.permute.xlu0 %1220 }
 0xab6   :  { %v1223_v9 = vadd.f32 %v1221_v31, %v1217_v25 }
 0xab8   :  { %2011 = vtanh.f32 %v1223_v9  ;;  %1229 = vrot.lane.b32.xlu0 %v1223_v9, %s2175_s4 }
 0xac2   :  { %v2012_v23 = vpop.eup %2011 }
 0xac3   :  { %v2669_v18 = vmul.f32 %v2012_v23, %v2010_v17 }
 0xac5   :  { %1236 = vrot.lane.b32.xlu1 %v2669_v18, %s2175_s4 }
 0xb2a   :  { %v1230_v6 = vpop.permute.xlu0 %1229 }
 0xb2b   :  { %v1232_v14 = vsel %vm1227_vm9, %v1230_v6, %v1212_v8 }
 0xb2c   :  { %1233 = vst.msk [vmem:[#allocation4] sm:$0xff] %vm388_vm1, %v1232_v14 }
 0xb33   :  { %v1365_v55 = vld [vmem:[#allocation4] sm:$0xff] }
 0xb34   :  { %1367 = vrot.lane.b32.xlu1 %v1365_v55, %s2175_s4 }
 0xb37   :  { %v1237_v22 = vpop.permute.xlu1 %1236 }
 0xb38   :  { %v1239_v41 = vsel %vm1227_vm9, %v1237_v22, %v1106_v33  ;;  %v1566_v22 = vld [vmem:[#allocation10] sm:$0xff] }
 0xb39   :  { %1240 = vst.msk [vmem:[#allocation3] sm:$0xff] %vm388_vm1, %v1239_v41 }
 0xb40   :  { %v1259_v3 = vld [vmem:[#allocation3] sm:$0xff] }
 0xb41   :  { %1771 = vmatmul.mubr.msk.f32.vlgmr.msra.gmra.mrb[6].mxu1 %vm388_vm1, %v1259_v3 }
 0xb42   :  { %1649 = vmatprep.mubr.f32.mxu1 %v2174_v4 }
 0xc14   :  { %v1345_v37 = vpop.f32.mrb[6].mxu1 }
 0xc15   :  { %v1350_v61 = vadd.f32 %v1345_v37, %v1257_v38  ;;  %v1347_v43 = vpop.f32.mrb[7].mxu1  ;;  %v1368_v38 = vpop.permute.xlu1 %1367 }
 0xc16   :  { %v1351_v8 = vadd.f32 %v1347_v43, %v1258_v36  ;;  %v1573_v43 = vld [vmem:[#allocation10 + $0x38] sm:$0xff] }
 0xc17   :  { %v1772_v45 = vmul.f32 -1.442695, %v1350_v61  ;;  %v1571_v61 = vld [vmem:[#allocation10 + $0x28] sm:$0xff] }
 0xc18   :  { %v1773_v62 = vmul.f32 -1.442695, %v1351_v8 }
 0xc19   :  { %2013 = vpow2.f32 %v1772_v45  ;;  %v1904_v45 = vpack.c.bf16 %v1573_v43, %v1571_v61 }
 0xc1a   :  { %2015 = vtanh.f32 %v1351_v8 }
 0xc23   :  { %v2014_v30 = vpop.eup %2013 }
 0xc24   :  { %v1355_v33 = vadd.f32 1.0, %v2014_v30  ;;  %v2016_v4 = vpop.eup %2015  ;;  %v1570_v30 = vld [vmem:[#allocation10 + $0x20] sm:$0xff] }
 0xc26   :  { %2017 = vrcp.f32 %v1355_v33  ;;  %v1572_v33 = vld [vmem:[#allocation10 + $0x30] sm:$0xff] }
 0xc27   :  { %2019 = vpow2.f32 %v1773_v62  ;;  %v1575_v62 = vld [vmem:[#allocation10 + $0x48] sm:$0xff] }
 0xc30   :  { %v2018_v0 = vpop.eup %2017 }
 0xc31   :  { %v1371_v10 = vmul.f32 %v2018_v0, %v2016_v4  ;;  %v2020_v29 = vpop.eup %2019  ;;  %v1370_v13 = vmul.f32 %v2018_v0, %v1368_v38  ;;  %v1906_v0 = vpack.c.bf16 %v1572_v33, %v1570_v30 }
 0xc32   :  { %v1362_v7 = vadd.f32 1.0, %v2020_v29  ;;  %v1577_v29 = vld [vmem:[#allocation10 + $0x58] sm:$0xff] }
 0xc33   :  { %1373 = vrot.lane.b32.xlu0 %v1371_v10, %s2175_s4  ;;  %v1908_v38 = vpack.c.bf16 %v1577_v29, %v1575_v62 }
 0xc34   :  { %2021 = vrcp.f32 %v1362_v7  ;;  %v1574_v7 = vld [vmem:[#allocation10 + $0x40] sm:$0xff] }
 0xc3e   :  { %v2022_v26 = vpop.eup %2021 }
 0xca5   :  { %v1374_v16 = vpop.permute.xlu0 %1373 }
 0xca6   :  { %v1376_v1 = vadd.f32 %v1374_v16, %v1370_v13  ;;  %v1576_v13 = vld [vmem:[#allocation10 + $0x50] sm:$0xff] }
 0xca7   :  { %v1910_v16 = vpack.c.bf16 %v1576_v13, %v1574_v7 }
 0xca8   :  { %2023 = vtanh.f32 %v1376_v1  ;;  %1382 = vrot.lane.b32.xlu0 %v1376_v1, %s2175_s4  ;;  %v1579_v1 = vld [vmem:[#allocation10 + $0x68] sm:$0xff] }
 0xcb2   :  { %v2024_v36 = vpop.eup %2023 }
 0xcb3   :  { %v2693_v19 = vmul.f32 %v2024_v36, %v2022_v26  ;;  %v1581_v26 = vld [vmem:[#allocation10 + $0x78] sm:$0xff] }
 0xcb4   :  { %v1912_v36 = vpack.c.bf16 %v1581_v26, %v1579_v1 }
 0xcb5   :  { %1389 = vrot.lane.b32.xlu1 %v2693_v19, %s2175_s4 }
 0xd1a   :  { %v1383_v32 = vpop.permute.xlu0 %1382 }
 0xd1b   :  { %v1385_v44 = vsel %vm1380_vm10, %v1383_v32, %v1365_v55  ;;  %v1914_v32 = vpack.c.bf16 %v1580_v27, %v1578_v24 }
 0xd1c   :  { %1386 = vst.msk [vmem:[#allocation4] sm:$0xff] %vm388_vm1, %v1385_v44 }
 0xd23   :  { %v2701_v5 = vld [vmem:[#allocation4] sm:$0xff] }
 0xd24   :  { %1520 = vrot.lane.b32.xlu1 %v2701_v5, %s2175_s4 }
 0xd27   :  { %v1390_v20 = vpop.permute.xlu1 %1389 }
 0xd28   :  { %v1392_v21 = vsel %vm1380_vm10, %v1390_v20, %v1259_v3  ;;  %v1568_v3 = vld [vmem:[#allocation10 + $0x10] sm:$0xff] }
 0xd29   :  { %1393 = vst.msk [vmem:[#allocation3] sm:$0xff] %vm388_vm1, %v1392_v21  ;;  %v1902_v60 = vpack.c.bf16 %v1568_v3, %v1566_v22 }
 0xd30   :  { %v2706_v28 = vld [vmem:[#allocation3] sm:$0xff] }
 0xd31   :  { %1774 = vmatmul.mubr.msk.f32.vlgmr.msra.gmra.mrb[20].mxu0 %vm388_vm1, %v2706_v28 }
 0xe04   :  { %v1498_v25 = vpop.f32.mrb[20].mxu0 }
 0xe05   :  { %v1503_v31 = vadd.f32 %v1498_v25, %v1410_v42  ;;  %v1500_v9 = vpop.f32.mrb[21].mxu0  ;;  %v1569_v42 = vld [vmem:[#allocation10 + $0x18] sm:$0xff]  ;;  %v2183_v25 = vmov 1  }
 0xe06   :  { %v1504_v17 = vadd.f32 %v1500_v9, %v1411_v46  ;;  %v1900_v41 = vpack.c.bf16 %v1569_v42, %v1567_v39  ;;  %v1521_v46 = vpop.permute.xlu1 %1520 }
 0xe07   :  { %v1775_v23 = vmul.f32 -1.442695, %v1503_v31  ;;  %v1532_v31 = vsel %vm421_vm4, 6, %v2183_v25 }
 0xe08   :  { %v1776_v57 = vmul.f32 -1.442695, %v1504_v17  ;;  %1901 = vmatprep.subr.bf16.mxu1 %v1900_v41  ;;  %vm1533_vm11 = vcmp.lt.s32.totalorder %v1532_v31, %v2543_v53 }
 0xe09   :  { %2025 = vpow2.f32 %v1775_v23  ;;  %1903 = vmatpush1.bf16.msra.mxu1 %v1902_v60 }
 0xe0a   :  { %2027 = vtanh.f32 %v1504_v17  ;;  %1905 = vmatprep.subr.bf16.mxu1 %v1904_v45 }
 0xe0d   :  { %1907 = vmatpush1.bf16.msra.mxu1 %v1906_v0 }
 0xe0e   :  { %1909 = vmatprep.subr.bf16.mxu1 %v1908_v38 }
 0xe11   :  { %1911 = vmatpush1.bf16.msra.mxu1 %v1910_v16 }
 0xe12   :  { %1913 = vmatprep.subr.bf16.mxu1 %v1912_v36 }
 0xe13   :  { %v2026_v35 = vpop.eup %2025 }
 0xe14   :  { %v1508_v48 = vadd.f32 1.0, %v2026_v35  ;;  %v2028_v6 = vpop.eup %2027  ;;  %v569_v35 = vsel %vm549_vm12, 1, %v2176_v49 }
 0xe15   :  { %1915 = vmatpush1.bf16.msra.mxu1 %v1914_v32 }
 0xe16   :  { %2029 = vrcp.f32 %v1508_v48 }
 0xe17   :  { %2031 = vpow2.f32 %v1776_v57  ;;  %v1088_v57 = vsel %vm1060_vm5, 1, %v2176_v49 }
 0xe20   :  { %v2030_v14 = vpop.eup %2029 }
 0xe21   :  { %v1524_v55 = vmul.f32 %v2030_v14, %v2028_v6  ;;  %v2032_v40 = vpop.eup %2031  ;;  %v1523_v8 = vmul.f32 %v2030_v14, %v1521_v46  ;;  %v750_v14 = vsel %vm722_vm14, 1, %v2176_v49 }
 0xe22   :  { %v1515_v37 = vadd.f32 1.0, %v2032_v40 }
 0xe23   :  { %1526 = vrot.lane.b32.xlu0 %v1524_v55, %s2175_s4 }
 0xe24   :  { %2033 = vrcp.f32 %v1515_v37 }
 0xe2e   :  { %v2034_v44 = vpop.eup %2033 }
 0xe95   :  { %v1527_v4 = vpop.permute.xlu0 %1526 }
 0xe96   :  { %v1529_v10 = vadd.f32 %v1527_v4, %v1523_v8 }
 0xe98   :  { %2035 = vtanh.f32 %v1529_v10  ;;  %1535 = vrot.lane.b32.xlu0 %v1529_v10, %s2175_s4 }
 0xea2   :  { %v2036_v20 = vpop.eup %2035 }
 0xea3   :  { %v2722_v21 = vmul.f32 %v2036_v20, %v2034_v44 }
 0xea5   :  { %1542 = vrot.lane.b32.xlu1 %v2722_v21, %s2175_s4 }
 0xf0a   :  { %v1536_v9 = vpop.permute.xlu0 %1535 }
 0xf0b   :  { %v1538_v17 = vsel %vm1533_vm11, %v1536_v9, %v2701_v5  ;;  %v738_v5 = vsel %vm721_vm13, 1, %v2176_v49 }
 0xf0c   :  { %1539 = vst.msk [vmem:[#allocation4] sm:$0xff] %vm388_vm1, %v1538_v17 }
 0xf13   :  { %v2732_v23 = vld [vmem:[#allocation4] sm:$0xff] }
 0xf14   :  { %1673 = vrot.lane.b32.xlu1 %v2732_v23, %s2175_s4 }
 0xf17   :  { %v1543_v48 = vpop.permute.xlu1 %1542 }
 0xf18   :  { %v1545_v6 = vsel %vm1533_vm11, %v1543_v48, %v2706_v28  ;;  %571 = vperm.xlu1 %1935, %v569_v35   ;;  %v919_v28 = vsel %vm891_vm15, 1, %v2176_v49  ;;  %vm591_vm15 = vcmask 523520  }
 0xf19   :  { %1546 = vst.msk [vmem:[#allocation3] sm:$0xff] %vm388_vm1, %v1545_v6 }
 0xf1c   :  { %740 = vperm.xlu1 %1935, %v738_v5  }
 0xf20   :  { %752 = vperm.xlu1 %1935, %v750_v14   ;;  %v2744_v55 = vld [vmem:[#allocation3] sm:$0xff] }
 0xf21   :  { %1777 = vmatmul.mubr.msk.f32.vlgmr.msra.gmra.mrb[8].mxu1 %vm388_vm1, %v2744_v55 }
 0xf24   :  { %921 = vperm.xlu1 %1935, %v919_v28  }
 0xf28   :  { %1090 = vperm.xlu1 %1935, %v1088_v57   ;;  %v1685_v57 = vsel %vm421_vm4, 7, %v2176_v49 }
 0xf29   :  { %vm1686_vm5 = vcmp.lt.s32.totalorder %v1685_v57, %v2543_v53 }
 0xf86   :  { %v1674_v39 = vpop.permute.xlu1 %1673 }
 0xf97   :  { %v2751_v42 = vpop.permute.xlu1 %571 }
 0xf98   :  { %vm573_vm6 = vcmp.eq.s32.totalorder %v2751_v42, 1 }
 0xf99   :  { %v574_v22 = vsel %vm573_vm6, %v2538_v51, 0.0 }
 0xf9a   :  { %576 = vrot.lane.b32.xlu1 %v574_v22, %s2175_s4 }
 0xf9b   :  { %v2758_v41 = vpop.permute.xlu1 %740 }
 0xf9c   :  { %vm742_vm7 = vcmp.eq.s32.totalorder %v2758_v41, 1 }
 0xf9d   :  { %v743_v3 = vsel %vm742_vm7, %v2575_v34, 0.0 }
 0xf9e   :  { %745 = vrot.lane.b32.xlu1 %v743_v3, %s2175_s4 }
 0xf9f   :  { %v2775_v43 = vpop.permute.xlu1 %752 }
 0xfa0   :  { %vm754_vm10 = vcmp.eq.s32.totalorder %v2775_v43, 1 }
 0xfa1   :  { %v755_v36 = vsel %vm754_vm10, %v2575_v34, 0.0 }
 0xfa3   :  { %v922_v8 = vpop.permute.xlu1 %921 }
 0xfa4   :  { %vm923_vm12 = vcmp.eq.s32.totalorder %v922_v8, 1 }
 0xfa5   :  { %v1394_v20 = vsel %vm923_vm12, %v2693_v19, 0.0 }
 0xfa7   :  { %v1091_v12 = vpop.permute.xlu1 %1090 }
 0xfa8   :  { %vm1092_vm14 = vcmp.eq.s32.totalorder %v1091_v12, 1 }
 0xfa9   :  { %v1093_v34 = vsel %vm1092_vm14, %v2638_v2, 0.0  ;;  %v1241_v44 = vsel %vm1092_vm14, %v2669_v18, 0.0 }
 0xff4   :  { %v1651_v60 = vpop.f32.mrb[8].mxu1 }
 0xff5   :  { %v1656_v40 = vadd.f32 %v1651_v60, %v1563_v63  ;;  %v1653_v46 = vpop.f32.mrb[9].mxu1  ;;  %v907_v63 = vsel %vm890_vm3, 1, %v2176_v49 }
 0xff6   :  { %v1657_v37 = vadd.f32 %v1653_v46, %v1564_v54  ;;  %v1076_v54 = vsel %vm1059_vm8, 1, %v2176_v49 }
 0xff7   :  { %v1778_v61 = vmul.f32 -1.442695, %v1656_v40 }
 0xff8   :  { %v1779_v4 = vmul.f32 -1.442695, %v1657_v37 }
 0xff9   :  { %2037 = vpow2.f32 %v1778_v61 }
 0xffa   :  { %2039 = vtanh.f32 %v1657_v37 }
0x1003   :  { %v2038_v45 = vpop.eup %2037 }
0x1004   :  { %v1661_v30 = vadd.f32 1.0, %v2038_v45  ;;  %v2040_v47 = vpop.eup %2039 }
0x1006   :  { %2041 = vrcp.f32 %v1661_v30 }
0x1007   :  { %2043 = vpow2.f32 %v1779_v4 }
0x100c   :  { %v577_v33 = vpop.permute.xlu1 %576 }
0x100d   :  { %579 = vst.msk [vmem:[#allocation11] sm:$0xff] %vm79_vm0, %v577_v33 }
0x1010   :  { %v2042_v50 = vpop.eup %2041  ;;  %v746_v15 = vpop.permute.xlu1 %745 }
0x1011   :  { %749 = vst.msk [vmem:[#allocation11 + $0x8] sm:$0xff] %vm79_vm0, %v746_v15  ;;  %v1677_v56 = vmul.f32 %v2042_v50, %v2040_v47  ;;  %v2044_v0 = vpop.eup %2043  ;;  %v1676_v62 = vmul.f32 %v2042_v50, %v1674_v39 }
0x1012   :  { %v1668_v10 = vadd.f32 1.0, %v2044_v0 }
0x1013   :  { %1679 = vrot.lane.b32.xlu0 %v1677_v56, %s2175_s4 }
0x1014   :  { %2045 = vrcp.f32 %v1668_v10 }
0x1017   :  { %582 = vperm.xlu0 %1936, %v580_v58  }
0x101b   :  { %909 = vperm.xlu0 %1936, %v907_v63  }
0x101e   :  { %v2046_v7 = vpop.eup %2045 }
0x101f   :  { %1078 = vperm.xlu0 %1936, %v1076_v54  }
0x1085   :  { %v1680_v29 = vpop.permute.xlu0 %1679 }
0x1086   :  { %v1682_v38 = vadd.f32 %v1680_v29, %v1676_v62 }
0x1088   :  { %2047 = vtanh.f32 %v1682_v38 }
0x1092   :  { %v2048_v13 = vpop.eup %2047 }
0x1093   :  { %v1684_v16 = vmul.f32 %v2048_v13, %v2046_v7 }
0x1095   :  { %v1706_v31 = vsel %vm573_vm6, %v1684_v16, 0.0 }
0x1096   :  { %v583_v1 = vpop.permute.xlu0 %582 }
0x1097   :  { %vm584_vm9 = vcmp.eq.s32.totalorder %v583_v1, 1 }
0x1098   :  { %v585_v11 = vsel %vm584_vm9, %v2538_v51, 0.0  ;;  %v924_v51 = vsel %vm923_vm12, %v2607_v52, 0.0  ;;  %v1700_v9 = vsel %vm584_vm9, %v1684_v16, 0.0 }
0x1099   :  { %587 = vrot.lane.b32.xlu0 %v585_v11, %s2175_s4 }
0x109a   :  { %v910_v26 = vpop.permute.xlu0 %909 }
0x109b   :  { %vm911_vm11 = vcmp.eq.s32.totalorder %v910_v26, 1 }
0x109c   :  { %v912_v24 = vsel %vm911_vm11, %v2607_v52, 0.0  ;;  %v1547_v52 = vsel %vm754_vm10, %v2722_v21, 0.0 }
0x109d   :  { %914 = vrot.lane.b32.xlu1 %v912_v24, %s2175_s4  ;;  %757 = vrot.lane.b32.xlu0 %v755_v36, %s2175_s4 }
0x109e   :  { %v1079_v27 = vpop.permute.xlu0 %1078 }
0x109f   :  { %vm1080_vm13 = vcmp.eq.s32.totalorder %v1079_v27, 1 }
0x10a0   :  { %v1081_v32 = vsel %vm1080_vm13, %v2638_v2, 0.0  ;;  %v1247_v25 = vsel %vm1080_vm13, %v2669_v18, 0.0  ;;  %v1400_v2 = vsel %vm911_vm11, %v2693_v19, 0.0  ;;  %v1553_v18 = vsel %vm742_vm7, %v2722_v21, 0.0 }
0x10a1   :  { %1083 = vrot.lane.b32.xlu1 %v1081_v32, %s2175_s4  ;;  %926 = vrot.lane.b32.xlu0 %v924_v51, %s2175_s4 }
0x10a5   :  { %1243 = vrot.lane.b32.xlu1 %v1241_v44, %s2175_s4  ;;  %1095 = vrot.lane.b32.xlu0 %v1093_v34, %s2175_s4 }
0x10a9   :  { %1396 = vrot.lane.b32.xlu1 %v1394_v20, %s2175_s4  ;;  %1249 = vrot.lane.b32.xlu0 %v1247_v25, %s2175_s4 }
0x10ad   :  { %1549 = vrot.lane.b32.xlu1 %v1547_v52, %s2175_s4  ;;  %1695 = vrot.lane.b32.xlu0 %v1684_v16, %s2175_s4 }
0x10b1   :  { %1688 = vrot.lane.b32.xlu1 %v1682_v38, %s2175_s4  ;;  %1402 = vrot.lane.b32.xlu0 %v1400_v2, %s2175_s4 }
0x10b5   :  { %1708 = vrot.lane.b32.xlu1 %v1706_v31, %s2175_s4  ;;  %1555 = vrot.lane.b32.xlu0 %v1553_v18, %s2175_s4 }
0x10b9   :  { %1702 = vrot.lane.b32.xlu0 %v1700_v9, %s2175_s4 }
0x110b   :  { %v588_v19 = vpop.permute.xlu0 %587 }
0x110c   :  { %592 = vst.msk [vmem:[#allocation11 + $0x38] sm:$0xff] %vm591_vm15, %v588_v19 }
0x110f   :  { %v758_v17 = vpop.permute.xlu0 %757  ;;  %v915_v35 = vpop.permute.xlu1 %914 }
0x1110   :  { %761 = vst.msk [vmem:[#allocation11 + $0x30] sm:$0xff] %vm591_vm15, %v758_v17 }
0x1111   :  { %918 = vst.msk [vmem:[#allocation11 + $0x10] sm:$0xff] %vm79_vm0, %v915_v35 }
0x1113   :  { %v927_v21 = vpop.permute.xlu0 %926  ;;  %v1084_v48 = vpop.permute.xlu1 %1083 }
0x1114   :  { %930 = vst.msk [vmem:[#allocation11 + $0x28] sm:$0xff] %vm591_vm15, %v927_v21 }
0x1115   :  { %1087 = vst.msk [vmem:[#allocation11 + $0x18] sm:$0xff] %vm79_vm0, %v1084_v48 }
0x1117   :  { %v1096_v6 = vpop.permute.xlu0 %1095  ;;  %v1244_v5 = vpop.permute.xlu1 %1243 }
0x1118   :  { %1099 = vst.msk [vmem:[#allocation11 + $0x20] sm:$0xff] %vm591_vm15, %v1096_v6 }
0x1119   :  { %1246 = vst.msk [vmem:[#allocation11 + $0x20] sm:$0xff] %vm79_vm0, %v1244_v5 }
0x111b   :  { %v1250_v14 = vpop.permute.xlu0 %1249  ;;  %v1397_v28 = vpop.permute.xlu1 %1396 }
0x111c   :  { %1252 = vst.msk [vmem:[#allocation11 + $0x18] sm:$0xff] %vm591_vm15, %v1250_v14 }
0x111d   :  { %1399 = vst.msk [vmem:[#allocation11 + $0x28] sm:$0xff] %vm79_vm0, %v1397_v28 }
0x111f   :  { %v1696_v39 = vpop.permute.xlu0 %1695  ;;  %v1550_v42 = vpop.permute.xlu1 %1549 }
0x1120   :  { %v1698_v22 = vsel %vm1686_vm5, %v1696_v39, %v2744_v55  ;;  %1552 = vst.msk [vmem:[#allocation11 + $0x30] sm:$0xff] %vm79_vm0, %v1550_v42 }
0x1121   :  { %1699 = vst.msk [vmem:[#allocation3] sm:$0xff] %vm388_vm1, %v1698_v22 }
0x1123   :  { %v1403_v41 = vpop.permute.xlu0 %1402  ;;  %v1689_v3 = vpop.permute.xlu1 %1688 }
0x1124   :  { %1405 = vst.msk [vmem:[#allocation11 + $0x10] sm:$0xff] %vm591_vm15, %v1403_v41  ;;  %v1691_v60 = vsel %vm1686_vm5, %v1689_v3, %v2732_v23 }
0x1125   :  { %1692 = vst.msk [vmem:[#allocation4] sm:$0xff] %vm388_vm1, %v1691_v60 }
0x1127   :  { %v1556_v49 = vpop.permute.xlu0 %1555  ;;  %v1709_v59 = vpop.permute.xlu1 %1708 }
0x1128   :  { %1558 = vst.msk [vmem:[#allocation11 + $0x8] sm:$0xff] %vm591_vm15, %v1556_v49  ;;  %1711 = vst.msk [vmem:[#allocation11] sm:$0xff] %vm591_vm15, %v1709_v59  ;;  %v1712_v53 = vld [vmem:[#allocation3] sm:$0xff] }
0x1129   :  { %1713 = vst.msk [vmem:[#allocation12] sm:$0xff] %vm388_vm1, %v1712_v53 }
0x112a   :  { %2126 = shalt.err (!%p2123_p0)
}
0x112b   :  { %s2127_s11 = scalar_lea.hbm %s2892_s8, 128 }
0x112c   :  { %p2128_p1 = scmp.ne.s32.totalorder %s2892_s8, %s2127_s11  ;;  %p2131_p2 = scmp.lt.u32.totalorder %s2127_s11, %s2892_s8 }
0x112e   :  { %p2133_p3 = pnand %p2131_p2, %p2128_p1 }
0x1130   :  { %2136 = shalt.err (!%p2133_p3)
}
0x1131   :  { %1735 = dma.vmem_to_hbm [thread:$0]  %s1733_s26, 128, %s2892_s8, [#allocation13]   ;;  %v1703_v23 = vpop.permute.xlu0 %1702 }
0x1132   :  { %1705 = vst.msk [vmem:[#allocation11 + $0x38] sm:$0xff] %vm79_vm0, %v1703_v23  ;;  %s2137_s21 = scalar_lea.vmem %s2848_s29, 1024  ;;  %p2142_p5 = scmp.lt.s32.totalorder %s2848_s29, %s2848_s29 }
0x1133   :  { %p2138_p4 = scmp.ne.s32.totalorder %s2848_s29, %s2137_s21  ;;  %p2143_p6 = scmp.lt.s32.totalorder %s2137_s21, %s2137_s21 }
0x1135   :  { %p2144_p7 = por %p2143_p6, %p2142_p5 }
0x1137   :  { %p2145_p8 = pnand %p2144_p7, %p2138_p4 }
0x1139   :  { %2148 = shalt.err (!%p2145_p8)
}
0x113a   :  { %s2149_s20 = scalar_lea.hbm %s2891_s7, 1024 }
0x113b   :  { %p2150_p9 = scmp.ne.s32.totalorder %s2891_s7, %s2149_s20  ;;  %p2153_p10 = scmp.lt.u32.totalorder %s2149_s20, %s2891_s7 }
0x113d   :  { %p2155_p11 = pnand %p2153_p10, %p2150_p9 }
0x113f   :  { %2158 = shalt.err (!%p2155_p11)
}
0x1140   :  { %1725 = dma.vmem_to_hbm [thread:$0]  %s2848_s29, 1024, %s2891_s7, [#allocation7], %s2171_s3, %s2171_s3, %s2172_s28  }
0x1141   :  { %2163 = dma.done.wait [#allocation7], 1024  }
0x1142   :  { %2164 = vsyncadd [#allocation7], 4294966272 }
0x1143   :  { %2165 = dma.done.wait [#allocation13], 128  }
0x1144   :  { %2166 = vsyncadd [#allocation13], 4294967168 }
0x1145   :  { %1742 = vsyncpa [#allocation6], 1 }
0x1146   :  { %1743 = vsyncpa [#allocation9], 1 }
0x1147   :  { %1744 = vsyncpa [#allocation7], 1 }
0x1148   :  { %1745 = vsyncpa [#allocation13], 1 }

</bundles_post_ra>
